<compile_context>
chip_gen: v5e
topology: v5e:2x2
jax: 0.10.0
libtpu: 0.0.40
codegen_flags: <defaults>
</compile_context>

<pallas_src>
import functools

import jax
import jax.numpy as jnp
from jax.experimental import pallas as pl
from jax.experimental.pallas import tpu as pltpu


def _round_up(x, m):
    return (x + m - 1) // m * m


# ---------------------------------------------------------------------------
# Fused single-step kernel: conv + batch-stat BN + LeakyReLU on the whole
# activation (used when it comfortably fits VMEM — fastest at small sizes).
# ---------------------------------------------------------------------------
def _make_fused_kernel(rows, eps, neg_slope):
    inv_n = 1.0 / float(rows)

    def kernel(p_ref, w_ref, g_ref, b_ref, o_ref):
        # p_ref: (rows, k_al)    im2col patches (K padded to a multiple of 8)
        # w_ref: (k_al, co_pad)  flattened HWIO weights, zero-padded
        # g_ref/b_ref: (1, co_pad) BN gamma/beta (padded lanes are 0)
        # o_ref: (rows, co_pad)  lane-dense output slab (doubles as act buffer)

        # Conv: a single MXU matmul, f32 accumulation, parked in o_ref
        # (no separate VMEM scratch).
        o_ref[...] = jnp.dot(p_ref[...], w_ref[...],
                             preferred_element_type=jnp.float32)

        # BatchNorm2d training-mode (biased) batch stats, single pass.
        a = o_ref[...]
        s = jnp.sum(a, axis=0, keepdims=True)
        s2 = jnp.sum(a * a, axis=0, keepdims=True)
        mean = s * inv_n
        var = jnp.maximum(s2 * inv_n - mean * mean, 0.0)
        inv_std = jax.lax.rsqrt(var + eps)          # EUP slot; effectively free
        scale = inv_std * g_ref[...]
        shift = b_ref[...] - mean * scale

        # Normalize + LeakyReLU, overwriting o_ref in place.
        y = o_ref[...] * scale + shift
        o_ref[...] = jnp.where(y > 0, y, neg_slope * y)

    return kernel


# ---------------------------------------------------------------------------
# Size-robust rows-tiled two-pass path.
# Pass 1: conv per row tile + resident per-channel sum/sumsq accumulators.
# ---------------------------------------------------------------------------
def _stats_kernel(p_ref, w_ref, act_ref, sum_ref, sumsq_ref):
    @pl.when(pl.program_id(0) == 0)
    def _():
        sum_ref[...] = jnp.zeros_like(sum_ref)
        sumsq_ref[...] = jnp.zeros_like(sumsq_ref)

    act_ref[...] = jnp.dot(p_ref[...], w_ref[...],
                           preferred_element_type=jnp.float32)
    a = act_ref[...]
    sum_ref[...] += jnp.sum(a, axis=0, keepdims=True)
    sumsq_ref[...] += jnp.sum(a * a, axis=0, keepdims=True)


# Pass 2: per-tile affine normalize + LeakyReLU (pure VPU work).
def _make_norm_kernel(neg_slope):
    def kernel(act_ref, scale_ref, shift_ref, o_ref):
        y = act_ref[...] * scale_ref[...] + shift_ref[...]
        o_ref[...] = jnp.where(y > 0, y, neg_slope * y)

    return kernel


@functools.partial(jax.jit, static_argnames=("eps", "neg_slope", "row_tile"))
def conv2d_bn_leaky(x_nchw, weight_oihw, gamma, beta,
                    eps=1e-5, neg_slope=0.1, row_tile=None):
    N, Cin, H, W = x_nchw.shape
    Co, Cin_w, KH, KW = weight_oihw.shape
    assert Cin == Cin_w
    # The module pads with (k-1)//2 symmetrically; exact "same" only for odd k.
    assert KH == KW and KH % 2 == 1
    pad = (KH - 1) // 2

    rows = N * H * W
    k2c = KH * KW * Cin
    assert rows % 8 == 0, "N*H*W must be a multiple of 8 (sublane granularity)"
    # Contraction dim padded only to sublane granularity (8), NOT 128 — cuts the
    # dominant patch HBM->VMEM DMA ~3.2x; legal because the last block dim below
    # equals the full array dim.  Mosaic masks the lane remainder in the dot.
    k_al = _round_up(k2c, 8)
    # Lane-dense output (unmasked vst).  Production channel counts on v6e/v7x
    # should round to 256 to fill the 2x256^2 MXU; for Co=8 that only adds waste.
    co_pad = _round_up(Co, 128)

    # ---- wrapper-side layout plumbing (HBM copies handled by XLA) ----------
    # TODO(synk): at realistic sizes build patches per-tile in VMEM (tap-wise
    # shifted matmuls) instead of materializing the KH*KW im2col blowup in HBM.
    x_nhwc = jnp.transpose(x_nchw, (0, 2, 3, 1)).astype(jnp.float32)
    x_sp = jnp.pad(x_nhwc, ((0, 0), (pad, pad), (pad, pad), (0, 0)))
    # im2col columns ordered (kh, kw, cin), matching the weight flattening below.
    cols = [x_sp[:, kh:kh + H, kw:kw + W, :] for kh in range(KH) for kw in range(KW)]
    patches = jnp.concatenate(cols, axis=-1).reshape(rows, k2c)
    patches = jnp.pad(patches, ((0, 0), (0, k_al - k2c)))

    w2 = jnp.transpose(weight_oihw, (2, 3, 1, 0)).reshape(k2c, Co).astype(jnp.float32)
    w2 = jnp.pad(w2, ((0, k_al - k2c), (0, co_pad - Co)))
    g2 = jnp.pad(gamma.reshape(1, Co).astype(jnp.float32), ((0, 0), (0, co_pad - Co)))
    b2 = jnp.pad(beta.reshape(1, Co).astype(jnp.float32), ((0, 0), (0, co_pad - Co)))
    # Operands stay f32: bf16 operands would break the 1e-3 match vs the f32
    # PyTorch/XLA reference at these input statistics (f32 accumulation either way).

    if row_tile is None or row_tile >= rows:
        # ---- fused single-step path (activation never leaves VMEM) ---------
        out = pl.pallas_call(
            _make_fused_kernel(rows, eps, neg_slope),
            out_shape=jax.ShapeDtypeStruct((rows, co_pad), jnp.float32),
            grid=(1,),
            in_specs=[
                pl.BlockSpec((rows, k_al), lambda i: (0, 0)),
                pl.BlockSpec((k_al, co_pad), lambda i: (0, 0)),
                pl.BlockSpec((1, co_pad), lambda i: (0, 0)),
                pl.BlockSpec((1, co_pad), lambda i: (0, 0)),
            ],
            out_specs=pl.BlockSpec((rows, co_pad), lambda i: (0, 0)),
            compiler_params=pltpu.CompilerParams(
                dimension_semantics=("arbitrary",)),
        )(patches, w2, g2, b2)
    else:
        # ---- rows-tiled two-pass BN path (size-robust, pipelined) ----------
        assert rows % row_tile == 0 and row_tile % 8 == 0
        n_tiles = rows // row_tile

        act, s, s2 = pl.pallas_call(
            _stats_kernel,
            out_shape=(
                jax.ShapeDtypeStruct((rows, co_pad), jnp.float32),
                jax.ShapeDtypeStruct((1, co_pad), jnp.float32),
                jax.ShapeDtypeStruct((1, co_pad), jnp.float32),
            ),
            grid=(n_tiles,),
            in_specs=[
                pl.BlockSpec((row_tile, k_al), lambda i: (i, 0)),
                pl.BlockSpec((k_al, co_pad), lambda i: (0, 0)),
            ],
            out_specs=(
                pl.BlockSpec((row_tile, co_pad), lambda i: (i, 0)),
                pl.BlockSpec((1, co_pad), lambda i: (0, 0)),   # resident accumulator
                pl.BlockSpec((1, co_pad), lambda i: (0, 0)),   # resident accumulator
            ),
            compiler_params=pltpu.CompilerParams(
                dimension_semantics=("arbitrary",)),  # accumulator across rows axis
        )(patches, w2)

        # Tiny (1, co_pad) stat math in the wrapper (negligible XLA work).
        mean = s / rows
        var = jnp.maximum(s2 / rows - mean * mean, 0.0)
        inv_std = jax.lax.rsqrt(var + eps)
        scale = inv_std * g2
        shift = b2 - mean * scale

        out = pl.pallas_call(
            _make_norm_kernel(neg_slope),
            out_shape=jax.ShapeDtypeStruct((rows, co_pad), jnp.float32),
            grid=(n_tiles,),
            in_specs=[
                pl.BlockSpec((row_tile, co_pad), lambda i: (i, 0)),
                pl.BlockSpec((1, co_pad), lambda i: (0, 0)),
                pl.BlockSpec((1, co_pad), lambda i: (0, 0)),
            ],
            out_specs=pl.BlockSpec((row_tile, co_pad), lambda i: (i, 0)),
            compiler_params=pltpu.CompilerParams(
                dimension_semantics=("parallel",)),   # shards across v7x's 2 TCs
        )(act, scale, shift)

    # Un-pad channels and go back to PyTorch NCHW convention (wrapper-side).
    out = out[:, :Co].reshape(N, H, W, Co)
    return jnp.transpose(out, (0, 3, 1, 2))


def _reference(x_nchw, weight_oihw, gamma, beta, eps=1e-5, neg_slope=0.1):
    KH = weight_oihw.shape[2]
    pad = (KH - 1) // 2
    y = jax.lax.conv_general_dilated(
        x_nchw, weight_oihw, window_strides=(1, 1),
        padding=[(pad, pad), (pad, pad)],
        dimension_numbers=("NCHW", "OIHW", "NCHW"),
    )
    mean = y.mean(axis=(0, 2, 3), keepdims=True)
    var = ((y - mean) ** 2).mean(axis=(0, 2, 3), keepdims=True)
    y = (y - mean) / jnp.sqrt(var + eps)
    y = y * gamma.reshape(1, -1, 1, 1) + beta.reshape(1, -1, 1, 1)
    return jnp.where(y > 0, y, neg_slope * y)


if __name__ == "__main__":
    # Conv2D_BN_Leaky(in_c=4, out_c=8, kernel_size=3) on a (2, 4, 16, 16) input.
    N, Cin, H, W = 2, 4, 16, 16
    Co, K = 8, 3

    key = jax.random.PRNGKey(0)
    kx, kw, kg, kb = jax.random.split(key, 4)
    x = jax.random.normal(kx, (N, Cin, H, W), dtype=jnp.float32)
    weight = jax.random.normal(kw, (Co, Cin, K, K), dtype=jnp.float32) * 0.1
    gamma = 1.0 + 0.1 * jax.random.normal(kg, (Co,), dtype=jnp.float32)
    beta = 0.1 * jax.random.normal(kb, (Co,), dtype=jnp.float32)

    ref = _reference(x, weight, gamma, beta)

    # Fused single-step path (the right structure at this toy size).
    out_fused = jax.block_until_ready(conv2d_bn_leaky(x, weight, gamma, beta))
    assert out_fused.shape == (N, Co, H, W)
    assert jnp.allclose(out_fused, ref, atol=1e-3, rtol=1e-3), "fused path mismatch"

    # Rows-tiled two-pass-BN path (the size-robust structure), exercised with a
    # small tile so the accumulator + parallel-normalize machinery is validated.
    out_tiled = jax.block_until_ready(
        conv2d_bn_leaky(x, weight, gamma, beta, row_tile=128))
    assert jnp.allclose(out_tiled, ref, atol=1e-3, rtol=1e-3), "tiled path mismatch"

    print("KERNEL_OK")
</pallas_src>

<mosaic_0001>
module attributes {stable_mosaic.version = 11 : i64} {
  func.func @kernel(%arg0: i32, %arg1: memref<512x40xf32, #tpu.memory_space<vmem>>, %arg2: memref<40x128xf32, #tpu.memory_space<vmem>>, %arg3: memref<1x128xf32, #tpu.memory_space<vmem>>, %arg4: memref<1x128xf32, #tpu.memory_space<vmem>>, %arg5: memref<512x128xf32, #tpu.memory_space<vmem>>) attributes {dimension_semantics = [#tpu.dimension_semantics<arbitrary>], iteration_bounds = array<i64: 1>, scalar_prefetch = 0 : i64, scratch_operands = 0 : i64, tpu.core_type = #tpu.core_type<tc>, window_params = [{pipeline_mode = #tpu.pipeline_mode<synchronous>, transform_indices = @transform_0, window_bounds = array<i64: 512, 40>}, {pipeline_mode = #tpu.pipeline_mode<synchronous>, transform_indices = @transform_1, window_bounds = array<i64: 40, 128>}, {pipeline_mode = #tpu.pipeline_mode<synchronous>, transform_indices = @transform_2, window_bounds = array<i64: 1, 128>}, {pipeline_mode = #tpu.pipeline_mode<synchronous>, transform_indices = @transform_3, window_bounds = array<i64: 1, 128>}, {pipeline_mode = #tpu.pipeline_mode<synchronous>, transform_indices = @transform_4, window_bounds = array<i64: 512, 128>}]} {
    %c0 = arith.constant 0 : index
    %c0_0 = arith.constant 0 : index
    %0 = vector.load %arg1[%c0, %c0_0] : memref<512x40xf32, #tpu.memory_space<vmem>>, vector<512x40xf32>
    %c0_1 = arith.constant 0 : index
    %c0_2 = arith.constant 0 : index
    %1 = vector.load %arg2[%c0_1, %c0_2] : memref<40x128xf32, #tpu.memory_space<vmem>>, vector<40x128xf32>
    %cst = arith.constant dense<0.000000e+00> : vector<512x128xf32>
    %2 = tpu.matmul %0, %1, %cst {dimension_numbers = #tpu.dot_dimension_numbers<[1], [0], [0], [1], [0, 0, 1, 1], [], []>} : vector<512x40xf32>, vector<40x128xf32>, vector<512x128xf32> -> vector<512x128xf32>
    %c0_3 = arith.constant 0 : index
    %c0_4 = arith.constant 0 : index
    %3 = vector.load %arg5[%c0_3, %c0_4] : memref<512x128xf32, #tpu.memory_space<vmem>>, vector<512x128xf32>
    tpu.vector_store %arg5[%c0_3, %c0_4], %2 {strides = array<i32>} : memref<512x128xf32, #tpu.memory_space<vmem>>, vector<512x128xf32>,
    %c0_5 = arith.constant 0 : index
    %c0_6 = arith.constant 0 : index
    %4 = vector.load %arg5[%c0_5, %c0_6] : memref<512x128xf32, #tpu.memory_space<vmem>>, vector<512x128xf32>
    %cst_7 = arith.constant dense<0.000000e+00> : vector<128xf32>
    %5 = vector.multi_reduction <add>, %4, %cst_7 [0] : vector<512x128xf32> to vector<128xf32>
    %6 = vector.shape_cast %5 : vector<128xf32> to vector<1x128xf32>
    %7 = arith.mulf %4, %4 : vector<512x128xf32>
    %cst_8 = arith.constant dense<0.000000e+00> : vector<128xf32>
    %8 = vector.multi_reduction <add>, %7, %cst_8 [0] : vector<512x128xf32> to vector<128xf32>
    %9 = vector.shape_cast %8 : vector<128xf32> to vector<1x128xf32>
    %cst_9 = arith.constant 0.001953125 : f32
    %10 = vector.broadcast %cst_9 : f32 to vector<1x128xf32>
    %11 = arith.mulf %6, %10 : vector<1x128xf32>
    %cst_10 = arith.constant 0.001953125 : f32
    %12 = vector.broadcast %cst_10 : f32 to vector<1x128xf32>
    %13 = arith.mulf %9, %12 : vector<1x128xf32>
    %14 = arith.mulf %11, %11 : vector<1x128xf32>
    %15 = arith.subf %13, %14 : vector<1x128xf32>
    %cst_11 = arith.constant 0.000000e+00 : f32
    %16 = vector.broadcast %cst_11 : f32 to vector<1x128xf32>
    %17 = arith.maximumf %15, %16 : vector<1x128xf32>
    %cst_12 = arith.constant 9.99999974E-6 : f32
    %18 = vector.broadcast %cst_12 : f32 to vector<1x128xf32>
    %19 = arith.addf %17, %18 : vector<1x128xf32>
    %20 = math.rsqrt %19 : vector<1x128xf32>
    %c0_13 = arith.constant 0 : index
    %c0_14 = arith.constant 0 : index
    %21 = vector.load %arg3[%c0_13, %c0_14] : memref<1x128xf32, #tpu.memory_space<vmem>>, vector<1x128xf32>
    %22 = arith.mulf %20, %21 : vector<1x128xf32>
    %c0_15 = arith.constant 0 : index
    %c0_16 = arith.constant 0 : index
    %23 = vector.load %arg4[%c0_15, %c0_16] : memref<1x128xf32, #tpu.memory_space<vmem>>, vector<1x128xf32>
    %24 = arith.mulf %11, %22 : vector<1x128xf32>
    %25 = arith.subf %23, %24 : vector<1x128xf32>
    %c0_17 = arith.constant 0 : index
    %c0_18 = arith.constant 0 : index
    %26 = vector.load %arg5[%c0_17, %c0_18] : memref<512x128xf32, #tpu.memory_space<vmem>>, vector<512x128xf32>
    %27 = vector.broadcast %22 : vector<1x128xf32> to vector<512x128xf32>
    %28 = arith.mulf %26, %27 : vector<512x128xf32>
    %29 = vector.broadcast %25 : vector<1x128xf32> to vector<512x128xf32>
    %30 = arith.addf %28, %29 : vector<512x128xf32>
    %cst_19 = arith.constant 0.000000e+00 : f32
    %31 = vector.broadcast %cst_19 : f32 to vector<512x128xf32>
    %32 = arith.cmpf ogt, %30, %31 : vector<512x128xf32>
    %cst_20 = arith.constant 1.000000e-01 : f32
    %33 = vector.broadcast %cst_20 : f32 to vector<512x128xf32>
    %34 = arith.mulf %33, %30 : vector<512x128xf32>
    %35 = arith.select %32, %30, %34 : vector<512x128xi1>, vector<512x128xf32>
    %c0_21 = arith.constant 0 : index
    %c0_22 = arith.constant 0 : index
    %36 = vector.load %arg5[%c0_21, %c0_22] : memref<512x128xf32, #tpu.memory_space<vmem>>, vector<512x128xf32>
    tpu.vector_store %arg5[%c0_21, %c0_22], %35 {strides = array<i32>} : memref<512x128xf32, #tpu.memory_space<vmem>>, vector<512x128xf32>,
    return
  }
  func.func @transform_0(%arg0: i32) -> (i32, i32) {
    %c0_i32 = arith.constant 0 : i32
    %c0_i32_0 = arith.constant 0 : i32
    %c0_i32_1 = arith.constant 0 : i32
    return %c0_i32, %c0_i32_0 : i32, i32
  }
  func.func @transform_1(%arg0: i32) -> (i32, i32) {
    %c0_i32 = arith.constant 0 : i32
    %c0_i32_0 = arith.constant 0 : i32
    %c0_i32_1 = arith.constant 0 : i32
    return %c0_i32, %c0_i32_0 : i32, i32
  }
  func.func @transform_2(%arg0: i32) -> (i32, i32) {
    %c0_i32 = arith.constant 0 : i32
    %c0_i32_0 = arith.constant 0 : i32
    %c0_i32_1 = arith.constant 0 : i32
    return %c0_i32, %c0_i32_0 : i32, i32
  }
  func.func @transform_3(%arg0: i32) -> (i32, i32) {
    %c0_i32 = arith.constant 0 : i32
    %c0_i32_0 = arith.constant 0 : i32
    %c0_i32_1 = arith.constant 0 : i32
    return %c0_i32, %c0_i32_0 : i32, i32
  }
  func.func @transform_4(%arg0: i32) -> (i32, i32) {
    %c0_i32 = arith.constant 0 : i32
    %c0_i32_0 = arith.constant 0 : i32
    %c0_i32_1 = arith.constant 0 : i32
    return %c0_i32, %c0_i32_0 : i32, i32
  }
}

</mosaic_0001>

<bundles_post_ra>
// kernel: conv2d_bn_leaky.1
= control target key start
LH: loop header
LB: loop body
LE: loop exit
PB: predicated region body
PF: predicated region fallthrough
CT: control target
= control target key end

     0   :  { %vm86_vm0 = vcmask 326656   ;;  %s2544_s1 = inlined_call_operand.vmem [shape: f32[40,128], index: 1, kind: input, shape index: {}]   ;;  %s2545_s0 = inlined_call_operand.vmem [shape: f32[512,40], index: 0, kind: input, shape index: {}]   ;;  %s2546_s2 = inlined_call_operand.vmem [shape: f32[1,128], index: 2, kind: input, shape index: {}]   ;;  %s2547_s3 = inlined_call_operand.vmem [shape: f32[1,128], index: 3, kind: input, shape index: {}]   ;;  %s2548_s4 = inlined_call_operand.vmem [shape: f32[512,128], index: 4, kind: output, shape index: {}]  }
   0x1   :  { %v85_v0 = vld [vmem:[%s2544_s1 + $0x20] sm:$0xff]  ;;  %v84_v1 = vld [vmem:[%s2544_s1 + $0x18] sm:$0xff]  ;;  %v83_v2 = vld [vmem:[%s2544_s1 + $0x10] sm:$0xff] }
   0x2   :  { %290 = vmatpush.msra.mxu0 %v85_v0  ;;  %1295 = vmatpush.msra.mxu1 %v85_v0  ;;  %v82_v3 = vld [vmem:[%s2544_s1 + $0x8] sm:$0xff]  ;;  %v81_v4 = vld [vmem:[%s2544_s1] sm:$0xff]  ;;  %v19_v9 = vld [vmem:[%s2545_s0 + $0x10] sm:$0xff] }
   0x3   :  { %1296 = vmatpush.msra.mxu2 %v85_v0  ;;  %1297 = vmatpush.msra.mxu3 %v85_v0  ;;  %v17_v5 = vld [vmem:[%s2545_s0] sm:$0xff]  ;;  %v18_v7 = vld [vmem:[%s2545_s0 + $0x8] sm:$0xff]  ;;  %v35_v10 = vld [vmem:[%s2545_s0 + $0x90] sm:$0xff] }
   0x4   :  { %291 = vmatpush.msra.mxu0 %v84_v1  ;;  %1298 = vmatpush.msra.mxu1 %v84_v1  ;;  %v33_v6 = vld [vmem:[%s2545_s0 + $0x80] sm:$0xff]  ;;  %v34_v8 = vld [vmem:[%s2545_s0 + $0x88] sm:$0xff]  ;;  %v20_v11 = vld [vmem:[%s2545_s0 + $0x18] sm:$0xff] }
   0x5   :  { %1299 = vmatpush.msra.mxu2 %v84_v1  ;;  %1300 = vmatpush.msra.mxu3 %v84_v1  ;;  %v36_v12 = vld [vmem:[%s2545_s0 + $0x98] sm:$0xff]  ;;  %v49_v13 = vld [vmem:[%s2545_s0 + $0x100] sm:$0xff]  ;;  %v50_v16 = vld [vmem:[%s2545_s0 + $0x108] sm:$0xff] }
   0x6   :  { %292 = vmatpush.msra.mxu0 %v83_v2  ;;  %1301 = vmatpush.msra.mxu1 %v83_v2  ;;  %v21_v14 = vld [vmem:[%s2545_s0 + $0x20] sm:$0xff]  ;;  %v22_v17 = vld [vmem:[%s2545_s0 + $0x28] sm:$0xff]  ;;  %v51_v19 = vld [vmem:[%s2545_s0 + $0x110] sm:$0xff] }
   0x7   :  { %1302 = vmatpush.msra.mxu2 %v83_v2  ;;  %1303 = vmatpush.msra.mxu3 %v83_v2  ;;  %v37_v15 = vld [vmem:[%s2545_s0 + $0xa0] sm:$0xff]  ;;  %v38_v18 = vld [vmem:[%s2545_s0 + $0xa8] sm:$0xff]  ;;  %v23_v20 = vld [vmem:[%s2545_s0 + $0x30] sm:$0xff] }
   0x8   :  { %293 = vmatpush.msra.mxu0 %v82_v3  ;;  %1304 = vmatpush.msra.mxu1 %v82_v3  ;;  %v39_v21 = vld [vmem:[%s2545_s0 + $0xb0] sm:$0xff]  ;;  %v52_v22 = vld [vmem:[%s2545_s0 + $0x118] sm:$0xff]  ;;  %v53_v25 = vld [vmem:[%s2545_s0 + $0x120] sm:$0xff] }
   0x9   :  { %1305 = vmatpush.msra.mxu2 %v82_v3  ;;  %1306 = vmatpush.msra.mxu3 %v82_v3  ;;  %v24_v23 = vld [vmem:[%s2545_s0 + $0x38] sm:$0xff]  ;;  %v65_v26 = vld [vmem:[%s2545_s0 + $0x180] sm:$0xff]  ;;  %v54_v29 = vld [vmem:[%s2545_s0 + $0x128] sm:$0xff] }
   0xa   :  { %294 = vmatpush.msra.mxu0 %v81_v4  ;;  %1307 = vmatpush.msra.mxu1 %v81_v4  ;;  %v40_v24 = vld [vmem:[%s2545_s0 + $0xb8] sm:$0xff]  ;;  %v25_v27 = vld [vmem:[%s2545_s0 + $0x40] sm:$0xff]  ;;  %v66_v30 = vld [vmem:[%s2545_s0 + $0x188] sm:$0xff] }
   0xb   :  { %1231 = vmatmul.msk.f32.vlgmr.msra.gmra.mxu0 %vm86_vm0, %v17_v5  ;;  %1247 = vmatmul.msk.f32.vlgmr.msra.gmra.mxu1 %vm86_vm0, %v33_v6  ;;  %v41_v28 = vld [vmem:[%s2545_s0 + $0xc0] sm:$0xff]  ;;  %v26_v31 = vld [vmem:[%s2545_s0 + $0x48] sm:$0xff]  ;;  %v55_v33 = vld [vmem:[%s2545_s0 + $0x130] sm:$0xff] }
   0xc   :  { %1308 = vmatpush.msra.mxu2 %v81_v4  ;;  %1309 = vmatpush.msra.mxu3 %v81_v4  ;;  %v42_v32 = vld [vmem:[%s2545_s0 + $0xc8] sm:$0xff]  ;;  %v67_v34 = vld [vmem:[%s2545_s0 + $0x190] sm:$0xff]  ;;  %v56_v37 = vld [vmem:[%s2545_s0 + $0x138] sm:$0xff] }
   0xd   :  { %1263 = vmatmul.msk.f32.vlgmr.msra.gmra.mxu2 %vm86_vm0, %v49_v13  ;;  %1279 = vmatmul.msk.f32.vlgmr.msra.gmra.mxu3 %vm86_vm0, %v65_v26  ;;  %v27_v35 = vld [vmem:[%s2545_s0 + $0x50] sm:$0xff]  ;;  %v68_v38 = vld [vmem:[%s2545_s0 + $0x198] sm:$0xff]  ;;  %v57_v41 = vld [vmem:[%s2545_s0 + $0x140] sm:$0xff] }
   0xe   :  { %v43_v36 = vld [vmem:[%s2545_s0 + $0xd0] sm:$0xff]  ;;  %v28_v39 = vld [vmem:[%s2545_s0 + $0x58] sm:$0xff]  ;;  %v69_v42 = vld [vmem:[%s2545_s0 + $0x1a0] sm:$0xff] }
   0xf   :  { %v44_v40 = vld [vmem:[%s2545_s0 + $0xd8] sm:$0xff]  ;;  %v29_v43 = vld [vmem:[%s2545_s0 + $0x60] sm:$0xff]  ;;  %v58_v45 = vld [vmem:[%s2545_s0 + $0x148] sm:$0xff] }
  0x10   :  { %v45_v44 = vld [vmem:[%s2545_s0 + $0xe0] sm:$0xff]  ;;  %v70_v46 = vld [vmem:[%s2545_s0 + $0x1a8] sm:$0xff]  ;;  %v59_v49 = vld [vmem:[%s2545_s0 + $0x150] sm:$0xff] }
  0x11   :  { %v30_v47 = vld [vmem:[%s2545_s0 + $0x68] sm:$0xff]  ;;  %v71_v50 = vld [vmem:[%s2545_s0 + $0x1b0] sm:$0xff]  ;;  %v60_v53 = vld [vmem:[%s2545_s0 + $0x158] sm:$0xff] }
  0x12   :  { %v46_v48 = vld [vmem:[%s2545_s0 + $0xe8] sm:$0xff]  ;;  %v31_v51 = vld [vmem:[%s2545_s0 + $0x70] sm:$0xff]  ;;  %v72_v54 = vld [vmem:[%s2545_s0 + $0x1b8] sm:$0xff] }
  0x13   :  { %1232 = vmatmul.msk.f32.gmra.mxu0 %vm86_vm0, %v18_v7  ;;  %1248 = vmatmul.msk.f32.gmra.mxu1 %vm86_vm0, %v34_v8  ;;  %v47_v52 = vld [vmem:[%s2545_s0 + $0xf0] sm:$0xff]  ;;  %v32_v55 = vld [vmem:[%s2545_s0 + $0x78] sm:$0xff]  ;;  %v61_v57 = vld [vmem:[%s2545_s0 + $0x160] sm:$0xff] }
  0x14   :  { %v48_v56 = vld [vmem:[%s2545_s0 + $0xf8] sm:$0xff]  ;;  %v73_v58 = vld [vmem:[%s2545_s0 + $0x1c0] sm:$0xff]  ;;  %v62_v61 = vld [vmem:[%s2545_s0 + $0x168] sm:$0xff] }
  0x15   :  { %1264 = vmatmul.msk.f32.gmra.mxu2 %vm86_vm0, %v50_v16  ;;  %1280 = vmatmul.msk.f32.gmra.mxu3 %vm86_vm0, %v66_v30  ;;  %v74_v62 = vld [vmem:[%s2545_s0 + $0x1c8] sm:$0xff]  ;;  %v63_v1 = vld [vmem:[%s2545_s0 + $0x170] sm:$0xff]  ;;  %v64_v5 = vld [vmem:[%s2545_s0 + $0x178] sm:$0xff] }
  0x16   :  { %v75_v2 = vld [vmem:[%s2545_s0 + $0x1d0] sm:$0xff]  ;;  %v76_v6 = vld [vmem:[%s2545_s0 + $0x1d8] sm:$0xff]  ;;  %v77_v8 = vld [vmem:[%s2545_s0 + $0x1e0] sm:$0xff] }
  0x17   :  { %v79_v16 = vld [vmem:[%s2545_s0 + $0x1f0] sm:$0xff] }
  0x1b   :  { %1233 = vmatmul.msk.f32.gmra.mxu0 %vm86_vm0, %v19_v9  ;;  %1249 = vmatmul.msk.f32.gmra.mxu1 %vm86_vm0, %v35_v10 }
  0x1d   :  { %1265 = vmatmul.msk.f32.gmra.mxu2 %vm86_vm0, %v51_v19  ;;  %1281 = vmatmul.msk.f32.gmra.mxu3 %vm86_vm0, %v67_v34 }
  0x23   :  { %1234 = vmatmul.msk.f32.gmra.mxu0 %vm86_vm0, %v20_v11  ;;  %1250 = vmatmul.msk.f32.gmra.mxu1 %vm86_vm0, %v36_v12  ;;  %v78_v12 = vld [vmem:[%s2545_s0 + $0x1e8] sm:$0xff] }
  0x25   :  { %1266 = vmatmul.msk.f32.gmra.mxu2 %vm86_vm0, %v52_v22  ;;  %1282 = vmatmul.msk.f32.gmra.mxu3 %vm86_vm0, %v68_v38 }
  0x2b   :  { %1235 = vmatmul.msk.f32.gmra.mxu0 %vm86_vm0, %v21_v14  ;;  %1251 = vmatmul.msk.f32.gmra.mxu1 %vm86_vm0, %v37_v15 }
  0x2d   :  { %1267 = vmatmul.msk.f32.gmra.mxu2 %vm86_vm0, %v53_v25  ;;  %1283 = vmatmul.msk.f32.gmra.mxu3 %vm86_vm0, %v69_v42 }
  0x33   :  { %1236 = vmatmul.msk.f32.gmra.mxu0 %vm86_vm0, %v22_v17  ;;  %1252 = vmatmul.msk.f32.gmra.mxu1 %vm86_vm0, %v38_v18 }
  0x35   :  { %1268 = vmatmul.msk.f32.gmra.mxu2 %vm86_vm0, %v54_v29  ;;  %1284 = vmatmul.msk.f32.gmra.mxu3 %vm86_vm0, %v70_v46 }
  0x3b   :  { %1237 = vmatmul.msk.f32.gmra.mxu0 %vm86_vm0, %v23_v20  ;;  %1253 = vmatmul.msk.f32.gmra.mxu1 %vm86_vm0, %v39_v21  ;;  %v80_v20 = vld [vmem:[%s2545_s0 + $0x1f8] sm:$0xff] }
  0x3d   :  { %1269 = vmatmul.msk.f32.gmra.mxu2 %vm86_vm0, %v55_v33  ;;  %1285 = vmatmul.msk.f32.gmra.mxu3 %vm86_vm0, %v71_v50 }
  0x43   :  { %1238 = vmatmul.msk.f32.gmra.mxu0 %vm86_vm0, %v24_v23  ;;  %1254 = vmatmul.msk.f32.gmra.mxu1 %vm86_vm0, %v40_v24 }
  0x45   :  { %1270 = vmatmul.msk.f32.gmra.mxu2 %vm86_vm0, %v56_v37  ;;  %1286 = vmatmul.msk.f32.gmra.mxu3 %vm86_vm0, %v72_v54 }
  0x4b   :  { %1239 = vmatmul.msk.f32.gmra.mxu0 %vm86_vm0, %v25_v27  ;;  %1255 = vmatmul.msk.f32.gmra.mxu1 %vm86_vm0, %v41_v28 }
  0x4d   :  { %1271 = vmatmul.msk.f32.gmra.mxu2 %vm86_vm0, %v57_v41  ;;  %1287 = vmatmul.msk.f32.gmra.mxu3 %vm86_vm0, %v73_v58 }
  0x53   :  { %1240 = vmatmul.msk.f32.gmra.mxu0 %vm86_vm0, %v26_v31  ;;  %1256 = vmatmul.msk.f32.gmra.mxu1 %vm86_vm0, %v42_v32 }
  0x55   :  { %1272 = vmatmul.msk.f32.gmra.mxu2 %vm86_vm0, %v58_v45  ;;  %1288 = vmatmul.msk.f32.gmra.mxu3 %vm86_vm0, %v74_v62 }
  0x5b   :  { %1241 = vmatmul.msk.f32.gmra.mxu0 %vm86_vm0, %v27_v35  ;;  %1257 = vmatmul.msk.f32.gmra.mxu1 %vm86_vm0, %v43_v36 }
  0x5d   :  { %1273 = vmatmul.msk.f32.gmra.mxu2 %vm86_vm0, %v59_v49  ;;  %1289 = vmatmul.msk.f32.gmra.mxu3 %vm86_vm0, %v75_v2 }
  0x63   :  { %1242 = vmatmul.msk.f32.gmra.mxu0 %vm86_vm0, %v28_v39  ;;  %1258 = vmatmul.msk.f32.gmra.mxu1 %vm86_vm0, %v44_v40 }
  0x65   :  { %1274 = vmatmul.msk.f32.gmra.mxu2 %vm86_vm0, %v60_v53  ;;  %1290 = vmatmul.msk.f32.gmra.mxu3 %vm86_vm0, %v76_v6 }
  0x6b   :  { %1243 = vmatmul.msk.f32.gmra.mxu0 %vm86_vm0, %v29_v43  ;;  %1259 = vmatmul.msk.f32.gmra.mxu1 %vm86_vm0, %v45_v44 }
  0x6d   :  { %1275 = vmatmul.msk.f32.gmra.mxu2 %vm86_vm0, %v61_v57  ;;  %1291 = vmatmul.msk.f32.gmra.mxu3 %vm86_vm0, %v77_v8 }
  0x73   :  { %1244 = vmatmul.msk.f32.gmra.mxu0 %vm86_vm0, %v30_v47  ;;  %1260 = vmatmul.msk.f32.gmra.mxu1 %vm86_vm0, %v46_v48 }
  0x75   :  { %1276 = vmatmul.msk.f32.gmra.mxu2 %vm86_vm0, %v62_v61  ;;  %1292 = vmatmul.msk.f32.gmra.mxu3 %vm86_vm0, %v78_v12 }
  0x7b   :  { %1245 = vmatmul.msk.f32.gmra.mxu0 %vm86_vm0, %v31_v51  ;;  %1261 = vmatmul.msk.f32.gmra.mxu1 %vm86_vm0, %v47_v52 }
  0x7d   :  { %1277 = vmatmul.msk.f32.gmra.mxu2 %vm86_vm0, %v63_v1  ;;  %1293 = vmatmul.msk.f32.gmra.mxu3 %vm86_vm0, %v79_v16 }
  0x83   :  { %1246 = vmatmul.msk.f32.gmra.mxu0 %vm86_vm0, %v32_v55  ;;  %1262 = vmatmul.msk.f32.gmra.mxu1 %vm86_vm0, %v48_v56 }
  0x85   :  { %1278 = vmatmul.msk.f32.gmra.mxu2 %vm86_vm0, %v64_v5  ;;  %1294 = vmatmul.msk.f32.gmra.mxu3 %vm86_vm0, %v80_v20 }
  0x88   :  { %v1568_v59 = vpop.f32.mrf.mxu0  ;;  %v1570_v60 = vpop.f32.mrf.mxu1 }
  0x89   :  { %v685_v39 = vmul.f32 %v1568_v59, %v1568_v59 }
  0x90   :  { %v1580_v63 = vpop.f32.mrf.mxu0  ;;  %v1582_v0 = vpop.f32.mrf.mxu1 }
  0x91   :  { %v1614_v11 = vpop.f32.mrf.mxu2  ;;  %v1648_v25 = vpop.f32.mrf.mxu3  ;;  %v686_v37 = vmul.f32 %v1580_v63, %v1580_v63  ;;  %v616_v40 = vadd.f32 %v1580_v63, %v1568_v59 }
  0x92   :  { %2589 = vst [vmem:[#allocation2_spill] sm:$0xff] %v1614_v11 }
  0x93   :  { %v749_v42 = vadd.f32 %v686_v37, %v685_v39 }
  0x98   :  { %v1592_v3 = vpop.f32.mrf.mxu0  ;;  %v1594_v4 = vpop.f32.mrf.mxu1 }
  0x99   :  { %v1624_v15 = vpop.f32.mrf.mxu2  ;;  %v1656_v29 = vpop.f32.mrf.mxu3  ;;  %v687_v41 = vmul.f32 %v1592_v3, %v1592_v3  ;;  %v617_v43 = vadd.f32 %v616_v40, %v1592_v3 }
  0x9a   :  { %2590 = vst [vmem:[#allocation3_spill] sm:$0xff] %v1624_v15 }
  0x9b   :  { %v750_v46 = vadd.f32 %v749_v42, %v687_v41 }
  0xa0   :  { %v1604_v7 = vpop.f32.mrf.mxu0  ;;  %v1609_v9 = vpop.f32.mrf.mxu1 }
  0xa1   :  { %v1634_v19 = vpop.f32.mrf.mxu2  ;;  %v1664_v33 = vpop.f32.mrf.mxu3  ;;  %v688_v44 = vmul.f32 %v1604_v7, %v1604_v7  ;;  %v618_v47 = vadd.f32 %v617_v43, %v1604_v7 }
  0xa2   :  { %2591 = vst [vmem:[#allocation4_spill] sm:$0xff] %v1634_v19 }
  0xa3   :  { %v751_v50 = vadd.f32 %v750_v46, %v688_v44 }
  0xa8   :  { %v1612_v10 = vpop.f32.mrf.mxu0  ;;  %v1620_v13 = vpop.f32.mrf.mxu1 }
  0xa9   :  { %v1644_v23 = vpop.f32.mrf.mxu2  ;;  %v1674_v38 = vpop.f32.mrf.mxu3  ;;  %v689_v48 = vmul.f32 %v1612_v10, %v1612_v10  ;;  %v619_v51 = vadd.f32 %v618_v47, %v1612_v10 }
  0xaa   :  { %2593 = vst [vmem:[#allocation6_spill] sm:$0xff] %v1644_v23 }
  0xab   :  { %v752_v54 = vadd.f32 %v751_v50, %v689_v48 }
  0xb0   :  { %v1622_v14 = vpop.f32.mrf.mxu0  ;;  %v1632_v18 = vpop.f32.mrf.mxu1 }
  0xb1   :  { %v1652_v27 = vpop.f32.mrf.mxu2  ;;  %v690_v52 = vmul.f32 %v1622_v14, %v1622_v14  ;;  %v620_v55 = vadd.f32 %v619_v51, %v1622_v14  ;;  %v1700_v57 = vpop.f32.mrf.mxu3 }
  0xb2   :  { %2595 = vst [vmem:[#allocation8_spill] sm:$0xff] %v1652_v27 }
  0xb3   :  { %v753_v58 = vadd.f32 %v752_v54, %v690_v52 }
  0xb8   :  { %v1630_v17 = vpop.f32.mrf.mxu0  ;;  %v1642_v22 = vpop.f32.mrf.mxu1 }
  0xb9   :  { %2592 = vst [vmem:[#allocation5_spill] sm:$0xff] %v1642_v22  ;;  %v1662_v32 = vpop.f32.mrf.mxu2  ;;  %v691_v56 = vmul.f32 %v1630_v17, %v1630_v17  ;;  %v621_v61 = vadd.f32 %v620_v55, %v1630_v17  ;;  %v1725_v47 = vpop.f32.mrf.mxu3 }
  0xba   :  { %2597 = vst [vmem:[#allocation10_spill] sm:$0xff] %v1662_v32 }
  0xbb   :  { %v754_v2 = vadd.f32 %v753_v58, %v691_v56 }
  0xc0   :  { %v1640_v21 = vpop.f32.mrf.mxu0  ;;  %v1650_v26 = vpop.f32.mrf.mxu1 }
  0xc1   :  { %2594 = vst [vmem:[#allocation7_spill] sm:$0xff] %v1650_v26  ;;  %v1670_v36 = vpop.f32.mrf.mxu2  ;;  %v692_v62 = vmul.f32 %v1640_v21, %v1640_v21  ;;  %v622_v5 = vadd.f32 %v621_v61, %v1640_v21 }
  0xc2   :  { %2599 = vst [vmem:[#allocation12_spill] sm:$0xff] %v1670_v36 }
  0xc3   :  { %v755_v8 = vadd.f32 %v754_v2, %v692_v62 }
  0xc8   :  { %v1646_v24 = vpop.f32.mrf.mxu0  ;;  %v1658_v30 = vpop.f32.mrf.mxu1 }
  0xc9   :  { %2596 = vst [vmem:[#allocation9_spill] sm:$0xff] %v1658_v30  ;;  %v1695_v53 = vpop.f32.mrf.mxu2  ;;  %v693_v6 = vmul.f32 %v1646_v24, %v1646_v24  ;;  %v623_v12 = vadd.f32 %v622_v5, %v1646_v24 }
  0xca   :  { %2601 = vst [vmem:[#allocation14_spill] sm:$0xff] %v1695_v53 }
  0xcb   :  { %v756_v37 = vadd.f32 %v755_v8, %v693_v6 }
  0xd0   :  { %v1654_v28 = vpop.f32.mrf.mxu0  ;;  %v1668_v35 = vpop.f32.mrf.mxu1 }
  0xd1   :  { %2598 = vst [vmem:[#allocation11_spill] sm:$0xff] %v1668_v35  ;;  %v694_v16 = vmul.f32 %v1654_v28, %v1654_v28  ;;  %v624_v39 = vadd.f32 %v623_v12, %v1654_v28  ;;  %v1718_v41 = vpop.f32.mrf.mxu2 }
  0xd2   :  { %2603 = vst [vmem:[#allocation16_spill] sm:$0xff] %v1718_v41 }
  0xd3   :  { %v757_v42 = vadd.f32 %v756_v37, %v694_v16 }
  0xd8   :  { %v1660_v31 = vpop.f32.mrf.mxu0  ;;  %v1690_v49 = vpop.f32.mrf.mxu1 }
  0xd9   :  { %2600 = vst [vmem:[#allocation13_spill] sm:$0xff] %v1690_v49  ;;  %v695_v40 = vmul.f32 %v1660_v31, %v1660_v31  ;;  %v625_v43 = vadd.f32 %v624_v39, %v1660_v31  ;;  %v1741_v8 = vpop.f32.mrf.mxu2  ;;  %v1746_v39 = vpop.f32.mrf.mxu3 }
  0xda   :  { %2605 = vst [vmem:[#allocation18_spill] sm:$0xff] %v1741_v8 }
  0xdb   :  { %v758_v48 = vadd.f32 %v757_v42, %v695_v40  ;;  %v701_v40 = vmul.f32 %v1570_v60, %v1570_v60 }
  0xe0   :  { %v1666_v34 = vpop.f32.mrf.mxu0  ;;  %v1713_v20 = vpop.f32.mrf.mxu1 }
  0xe1   :  { %2602 = vst [vmem:[#allocation15_spill] sm:$0xff] %v1713_v20  ;;  %v696_v44 = vmul.f32 %v1666_v34, %v1666_v34  ;;  %v626_v50 = vadd.f32 %v625_v43, %v1666_v34 }
  0xe3   :  { %v759_v52 = vadd.f32 %v758_v48, %v696_v44  ;;  %v702_v44 = vmul.f32 %v1582_v0, %v1582_v0 }
  0xe8   :  { %v1685_v45 = vpop.f32.mrf.mxu0  ;;  %v1736_v62 = vpop.f32.mrf.mxu1 }
  0xe9   :  { %v697_v51 = vmul.f32 %v1685_v45, %v1685_v45  ;;  %v627_v54 = vadd.f32 %v626_v50, %v1685_v45  ;;  %2604 = vst [vmem:[#allocation17_spill] sm:$0xff] %v1736_v62 }
  0xeb   :  { %v760_v56 = vadd.f32 %v759_v52, %v697_v51  ;;  %v703_v51 = vmul.f32 %v1594_v4, %v1594_v4 }
  0xf0   :  { %v1705_v1 = vpop.f32.mrf.mxu0 }
  0xf1   :  { %v698_v55 = vmul.f32 %v1705_v1, %v1705_v1  ;;  %v628_v58 = vadd.f32 %v627_v54, %v1705_v1 }
  0xf3   :  { %v761_v2 = vadd.f32 %v760_v56, %v698_v55  ;;  %v1757_v55 = vpop.f32.mrf.mxu1  ;;  %v704_v56 = vmul.f32 %v1609_v9, %v1609_v9 }
  0xf4   :  { %2606 = vst [vmem:[#allocation19_spill] sm:$0xff] %v1757_v55 }
  0xf8   :  { %v1723_v46 = vpop.f32.mrf.mxu0 }
  0xf9   :  { %v699_v61 = vmul.f32 %v1723_v46, %v1723_v46  ;;  %v629_v5 = vadd.f32 %v628_v58, %v1723_v46 }
  0xfb   :  { %v762_v12 = vadd.f32 %v761_v2, %v699_v61  ;;  %v1762_v2 = vpop.f32.mrf.mxu2 }
  0xfc   :  { %2607 = vst [vmem:[#allocation20_spill] sm:$0xff] %v1762_v2 }
 0x100   :  { %v1739_v6 = vpop.f32.mrf.mxu0 }
 0x101   :  { %v630_v16 = vadd.f32 %v629_v5, %v1739_v6  ;;  %v700_v37 = vmul.f32 %v1739_v6, %v1739_v6  ;;  %v705_v5 = vmul.f32 %v1620_v13, %v1620_v13 }
 0x103   :  { %v631_v42 = vadd.f32 %v630_v16, %v1570_v60  ;;  %v763_v43 = vadd.f32 %v762_v12, %v700_v37  ;;  %v1767_v37 = vpop.f32.mrf.mxu3 }
 0x105   :  { %v632_v48 = vadd.f32 %v631_v42, %v1582_v0  ;;  %v764_v50 = vadd.f32 %v763_v43, %v701_v40  ;;  %v706_v40 = vmul.f32 %v1632_v18, %v1632_v18 }
 0x107   :  { %v633_v52 = vadd.f32 %v632_v48, %v1594_v4  ;;  %v765_v54 = vadd.f32 %v764_v50, %v702_v44  ;;  %v707_v44 = vmul.f32 %v1642_v22, %v1642_v22 }
 0x109   :  { %v634_v58 = vadd.f32 %v633_v52, %v1609_v9  ;;  %v766_v61 = vadd.f32 %v765_v54, %v703_v51  ;;  %v708_v51 = vmul.f32 %v1650_v26, %v1650_v26 }
 0x10b   :  { %v635_v12 = vadd.f32 %v634_v58, %v1620_v13  ;;  %v767_v16 = vadd.f32 %v766_v61, %v704_v56  ;;  %v1778_v56 = vpop.f32.mrf.mxu1  ;;  %v709_v58 = vmul.f32 %v1658_v30, %v1658_v30 }
 0x10c   :  { %2608 = vst [vmem:[#allocation21_spill] sm:$0xff] %v1778_v56 }
 0x10d   :  { %v768_v42 = vadd.f32 %v767_v16, %v705_v5  ;;  %v636_v43 = vadd.f32 %v635_v12, %v1632_v18  ;;  %v1783_v12 = vpop.f32.mrf.mxu2  ;;  %v710_v16 = vmul.f32 %v1668_v35, %v1668_v35 }
 0x10e   :  { %2609 = vst [vmem:[#allocation22_spill] sm:$0xff] %v1783_v12 }
 0x10f   :  { %v637_v48 = vadd.f32 %v636_v43, %v1642_v22  ;;  %v769_v50 = vadd.f32 %v768_v42, %v706_v40  ;;  %v1788_v43 = vpop.f32.mrf.mxu3 }
 0x111   :  { %v638_v52 = vadd.f32 %v637_v48, %v1650_v26  ;;  %v770_v54 = vadd.f32 %v769_v50, %v707_v44  ;;  %v711_v44 = vmul.f32 %v1690_v49, %v1690_v49 }
 0x113   :  { %v639_v61 = vadd.f32 %v638_v52, %v1658_v30  ;;  %v771_v5 = vadd.f32 %v770_v54, %v708_v51  ;;  %v712_v51 = vmul.f32 %v1713_v20, %v1713_v20 }
 0x115   :  { %v640_v40 = vadd.f32 %v639_v61, %v1668_v35  ;;  %v772_v42 = vadd.f32 %v771_v5, %v709_v58  ;;  %v713_v58 = vmul.f32 %v1736_v62, %v1736_v62  ;;  %v1799_v61 = vpop.f32.mrf.mxu1 }
 0x116   :  { %2610 = vst [vmem:[#allocation23_spill] sm:$0xff] %v1799_v61 }
 0x117   :  { %v641_v48 = vadd.f32 %v640_v40, %v1690_v49  ;;  %v773_v50 = vadd.f32 %v772_v42, %v710_v16  ;;  %v714_v16 = vmul.f32 %v1757_v55, %v1757_v55  ;;  %v1804_v40 = vpop.f32.mrf.mxu2 }
 0x118   :  { %2611 = vst [vmem:[#allocation24_spill] sm:$0xff] %v1804_v40 }
 0x119   :  { %v642_v26 = vadd.f32 %v641_v48, %v1713_v20  ;;  %v774_v52 = vadd.f32 %v773_v50, %v711_v44  ;;  %v715_v44 = vmul.f32 %v1778_v56, %v1778_v56  ;;  %v1811_v50 = vpop.f32.mrf.mxu3 }
 0x11b   :  { %v775_v54 = vadd.f32 %v774_v52, %v712_v51  ;;  %v643_v30 = vadd.f32 %v642_v26, %v1736_v62  ;;  %v716_v26 = vmul.f32 %v1799_v61, %v1799_v61 }
 0x11d   :  { %v776_v5 = vadd.f32 %v775_v54, %v713_v58  ;;  %v644_v35 = vadd.f32 %v643_v30, %v1757_v55  ;;  %v717_v30 = vmul.f32 %v1614_v11, %v1614_v11 }
 0x11f   :  { %v777_v42 = vadd.f32 %v776_v5, %v714_v16  ;;  %v645_v48 = vadd.f32 %v644_v35, %v1778_v56  ;;  %v718_v35 = vmul.f32 %v1624_v15, %v1624_v15  ;;  %v719_v56 = vmul.f32 %v1634_v19, %v1634_v19 }
 0x121   :  { %v778_v51 = vadd.f32 %v777_v42, %v715_v44  ;;  %v646_v52 = vadd.f32 %v645_v48, %v1799_v61  ;;  %v1823_v44 = vpop.f32.mrf.mxu2  ;;  %v720_v48 = vmul.f32 %v1644_v23, %v1644_v23 }
 0x122   :  { %2612 = vst [vmem:[#allocation25_spill] sm:$0xff] %v1823_v44 }
 0x123   :  { %v647_v54 = vadd.f32 %v646_v52, %v1614_v11  ;;  %v779_v58 = vadd.f32 %v778_v51, %v716_v26  ;;  %v1828_v51 = vpop.f32.mrf.mxu3 }
 0x125   :  { %v648_v5 = vadd.f32 %v647_v54, %v1624_v15  ;;  %v780_v16 = vadd.f32 %v779_v58, %v717_v30  ;;  %v721_v54 = vmul.f32 %v1652_v27, %v1652_v27 }
 0x127   :  { %v649_v55 = vadd.f32 %v648_v5, %v1634_v19  ;;  %v781_v42 = vadd.f32 %v780_v16, %v718_v35  ;;  %v722_v5 = vmul.f32 %v1662_v32, %v1662_v32  ;;  %v723_v19 = vmul.f32 %v1670_v36, %v1670_v36 }
 0x129   :  { %v650_v52 = vadd.f32 %v649_v55, %v1644_v23  ;;  %v782_v26 = vadd.f32 %v781_v42, %v719_v56  ;;  %v724_v42 = vmul.f32 %v1695_v53, %v1695_v53 }
 0x12b   :  { %v651_v30 = vadd.f32 %v650_v52, %v1652_v27  ;;  %v783_v58 = vadd.f32 %v782_v26, %v720_v48  ;;  %v1842_v52 = vpop.f32.mrf.mxu2  ;;  %v725_v48 = vmul.f32 %v1718_v41, %v1718_v41 }
 0x12d   :  { %v784_v35 = vadd.f32 %v783_v58, %v721_v54  ;;  %v652_v16 = vadd.f32 %v651_v30, %v1662_v32  ;;  %v1847_v30 = vpop.f32.mrf.mxu3  ;;  %v726_v58 = vmul.f32 %v1741_v8, %v1741_v8 }
 0x12f   :  { %v653_v55 = vadd.f32 %v652_v16, %v1670_v36  ;;  %v785_v56 = vadd.f32 %v784_v35, %v722_v5  ;;  %v727_v16 = vmul.f32 %v1762_v2, %v1762_v2 }
 0x131   :  { %v654_v23 = vadd.f32 %v653_v55, %v1695_v53  ;;  %v786_v15 = vadd.f32 %v785_v56, %v723_v19  ;;  %v729_v53 = vmul.f32 %v1804_v40, %v1804_v40 }
 0x133   :  { %v655_v26 = vadd.f32 %v654_v23, %v1718_v41  ;;  %v787_v54 = vadd.f32 %v786_v15, %v724_v42  ;;  %v728_v23 = vmul.f32 %v1783_v12, %v1783_v12 }
 0x135   :  { %v656_v5 = vadd.f32 %v655_v26, %v1741_v8  ;;  %v788_v35 = vadd.f32 %v787_v54, %v725_v48  ;;  %v1861_v26 = vpop.f32.mrf.mxu2 }
 0x137   :  { %v657_v19 = vadd.f32 %v656_v5, %v1762_v2  ;;  %v789_v55 = vadd.f32 %v788_v35, %v726_v58  ;;  %v730_v58 = vmul.f32 %v1823_v44, %v1823_v44  ;;  %v1866_v5 = vpop.f32.mrf.mxu3 }
 0x139   :  { %v658_v56 = vadd.f32 %v657_v19, %v1783_v12  ;;  %v790_v15 = vadd.f32 %v789_v55, %v727_v16  ;;  %v731_v16 = vmul.f32 %v1842_v52, %v1842_v52  ;;  %v732_v55 = vmul.f32 %v1861_v26, %v1861_v26 }
 0x13b   :  { %v791_v42 = vadd.f32 %v790_v15, %v728_v23  ;;  %v659_v41 = vadd.f32 %v658_v56, %v1804_v40  ;;  %v739_v40 = vmul.f32 %v1746_v39, %v1746_v39 }
 0x13d   :  { %v792_v48 = vadd.f32 %v791_v42, %v729_v53  ;;  %v660_v54 = vadd.f32 %v659_v41, %v1823_v44  ;;  %v733_v53 = vmul.f32 %v1648_v25, %v1648_v25  ;;  %v734_v42 = vmul.f32 %v1656_v29, %v1656_v29 }
 0x13f   :  { %v793_v35 = vadd.f32 %v792_v48, %v730_v58  ;;  %v661_v19 = vadd.f32 %v660_v54, %v1842_v52  ;;  %v735_v58 = vmul.f32 %v1664_v33, %v1664_v33 }
 0x141   :  { %v794_v56 = vadd.f32 %v793_v35, %v731_v16  ;;  %v662_v23 = vadd.f32 %v661_v19, %v1861_v26  ;;  %v1883_v16 = vpop.f32.mrf.mxu3  ;;  %v736_v19 = vmul.f32 %v1674_v38, %v1674_v38 }
 0x143   :  { %v663_v41 = vadd.f32 %v662_v23, %v1648_v25  ;;  %v795_v15 = vadd.f32 %v794_v56, %v732_v55  ;;  %v737_v56 = vmul.f32 %v1700_v57, %v1700_v57 }
 0x145   :  { %v796_v48 = vadd.f32 %v795_v15, %v733_v53  ;;  %v664_v54 = vadd.f32 %v663_v41, %v1656_v29 }
 0x147   :  { %v665_v44 = vadd.f32 %v664_v54, %v1664_v33  ;;  %v797_v35 = vadd.f32 %v796_v48, %v734_v42  ;;  %v738_v54 = vmul.f32 %v1725_v47, %v1725_v47 }
 0x149   :  { %v666_v23 = vadd.f32 %v665_v44, %v1674_v38  ;;  %v798_v55 = vadd.f32 %v797_v35, %v735_v58  ;;  %v740_v58 = vmul.f32 %v1767_v37, %v1767_v37 }
 0x14b   :  { %v667_v53 = vadd.f32 %v666_v23, %v1700_v57  ;;  %v799_v41 = vadd.f32 %v798_v55, %v736_v19  ;;  %v1900_v23 = vpop.f32.mrf.mxu3  ;;  %v741_v55 = vmul.f32 %v1788_v43, %v1788_v43 }
 0x14d   :  { %v668_v15 = vadd.f32 %v667_v53, %v1725_v47  ;;  %v800_v42 = vadd.f32 %v799_v41, %v737_v56  ;;  %v742_v41 = vmul.f32 %v1811_v50, %v1811_v50 }
 0x14f   :  { %v669_v48 = vadd.f32 %v668_v15, %v1746_v39  ;;  %v801_v12 = vadd.f32 %v800_v42, %v738_v54  ;;  %v743_v42 = vmul.f32 %v1828_v51, %v1828_v51 }
 0x151   :  { %v670_v44 = vadd.f32 %v669_v48, %v1767_v37  ;;  %v802_v35 = vadd.f32 %v801_v12, %v739_v40  ;;  %v744_v48 = vmul.f32 %v1847_v30, %v1847_v30 }
 0x153   :  { %v671_v19 = vadd.f32 %v670_v44, %v1788_v43  ;;  %v803_v56 = vadd.f32 %v802_v35, %v740_v58  ;;  %v745_v35 = vmul.f32 %v1866_v5, %v1866_v5  ;;  %v1917_v2 = vpop.f32.mrf.mxu3 }
 0x155   :  { %v672_v53 = vadd.f32 %v671_v19, %v1811_v50  ;;  %v804_v15 = vadd.f32 %v803_v56, %v741_v55  ;;  %v746_v56 = vmul.f32 %v1883_v16, %v1883_v16 }
 0x157   :  { %v673_v54 = vadd.f32 %v672_v53, %v1828_v51  ;;  %v805_v12 = vadd.f32 %v804_v15, %v742_v41  ;;  %v747_v15 = vmul.f32 %v1900_v23, %v1900_v23 }
 0x159   :  { %v674_v40 = vadd.f32 %v673_v54, %v1847_v30  ;;  %v806_v44 = vadd.f32 %v805_v12, %v743_v42  ;;  %v748_v54 = vmul.f32 %v1917_v2, %v1917_v2 }
 0x15b   :  { %v675_v58 = vadd.f32 %v674_v40, %v1866_v5  ;;  %v807_v19 = vadd.f32 %v806_v44, %v744_v48 }
 0x15d   :  { %v676_v55 = vadd.f32 %v675_v58, %v1883_v16  ;;  %v808_v53 = vadd.f32 %v807_v19, %v745_v35 }
 0x15f   :  { %v677_v41 = vadd.f32 %v676_v55, %v1900_v23  ;;  %v809_v42 = vadd.f32 %v808_v53, %v746_v56 }
 0x161   :  { %v678_v12 = vadd.f32 %v677_v41, %v1917_v2  ;;  %v810_v40 = vadd.f32 %v809_v42, %v747_v15 }
 0x163   :  { %v679_v48 = vrot.slane %v678_v12, 4  ;;  %v811_v44 = vadd.f32 %v810_v40, %v748_v54 }
 0x165   :  { %v680_v8 = vadd.f32 %v679_v48, %v678_v12  ;;  %v812_v58 = vrot.slane %v811_v44, 4 }
 0x167   :  { %v681_v36 = vrot.slane %v680_v8, 2  ;;  %v813_v32 = vadd.f32 %v812_v58, %v811_v44 }
 0x169   :  { %v682_v27 = vadd.f32 %v681_v36, %v680_v8  ;;  %v814_v35 = vrot.slane %v813_v32, 2 }
 0x16b   :  { %v683_v19 = vrot.slane %v682_v27, 1  ;;  %v815_v55 = vadd.f32 %v814_v35, %v813_v32 }
 0x16d   :  { %v684_v11 = vadd.f32 %v683_v19, %v682_v27  ;;  %v816_v61 = vrot.slane %v815_v55, 1 }
 0x16f   :  { %v817_v62 = vadd.f32 %v816_v61, %v815_v55  ;;  %v818_v20 = vmul.f32 0.001953125, %v684_v11  ;;  %v834_v11 = vld [vmem:[%s2546_s2] sm:$0x1] }
 0x171   :  { %v819_v49 = vmul.f32 0.001953125, %v817_v62  ;;  %v820_v22 = vmul.f32 %v818_v20, %v818_v20 }
 0x173   :  { %v821_v56 = vsub.f32 %v819_v49, %v820_v22  ;;  %v836_v22 = vld [vmem:[%s2547_s3] sm:$0x1] }
 0x175   :  { %v822_v53 = vmax.f32 %v821_v56, 0.0 }
 0x177   :  { %v823_v41 = vadd.f32 1e-05, %v822_v53 }
 0x179   :  { %1310 = vrsqrt.f32 %v823_v41  ;;  %vm830_vm2 = vweird.f32 %v823_v41 }
 0x17f   :  { %v1311_v15 = vpop.eup %1310 }
 0x180   :  { %v825_v54 = vmul.f32 %v1311_v15, %v823_v41  ;;  %vm831_vm1 = vweird.f32 %v1311_v15 }
 0x181   :  { %vm832_vm3 = vmor %vm830_vm2, %vm831_vm1 }
 0x182   :  { %v826_v42 = vmul.f32 %v1311_v15, %v825_v54 }
 0x184   :  { %v827_v12 = vmul.f32 0.5, %v826_v42 }
 0x186   :  { %v828_v40 = vsub.f32 1.5, %v827_v12 }
 0x188   :  { %v829_v48 = vmul.f32 %v1311_v15, %v828_v40 }
 0x18a   :  { %v833_v32 = vsel %vm832_vm3, %v1311_v15, %v829_v48 }
 0x18b   :  { %v835_v27 = vmul.f32 %v834_v11, %v833_v32 }
 0x18d   :  { %v837_v36 = vmul.f32 %v835_v27, %v818_v20  ;;  %v1934_v49 = vperm.slane %v835_v27, 0 }
 0x18f   :  { %v838_v62 = vsub.f32 %v836_v22, %v837_v36  ;;  %v886_v8 = vmul.f32 %v1934_v49, %v1842_v52  ;;  %v887_v61 = vmul.f32 %v1934_v49, %v1861_v26  ;;  %v888_v44 = vmul.f32 %v1934_v49, %v1648_v25 }
 0x190   :  { %v889_v58 = vmul.f32 %v1934_v49, %v1656_v29  ;;  %v890_v35 = vmul.f32 %v1934_v49, %v1664_v33  ;;  %v891_v19 = vmul.f32 %v1934_v49, %v1674_v38  ;;  %v892_v52 = vmul.f32 %v1934_v49, %v1700_v57 }
 0x191   :  { %v1944_v20 = vperm.slane %v838_v62, 0  ;;  %v893_v26 = vmul.f32 %v1934_v49, %v1725_v47  ;;  %v894_v25 = vmul.f32 %v1934_v49, %v1746_v39  ;;  %v895_v29 = vmul.f32 %v1934_v49, %v1767_v37 }
 0x192   :  { %v896_v55 = vmul.f32 %v1934_v49, %v1788_v43  ;;  %v897_v33 = vmul.f32 %v1934_v49, %v1811_v50  ;;  %v898_v38 = vmul.f32 %v1934_v49, %v1828_v51  ;;  %v899_v57 = vmul.f32 %v1934_v49, %v1847_v30 }
 0x193   :  { %v900_v47 = vmul.f32 %v1934_v49, %v1866_v5  ;;  %v901_v39 = vmul.f32 %v1934_v49, %v1883_v16  ;;  %v902_v37 = vmul.f32 %v1934_v49, %v1900_v23  ;;  %v903_v43 = vmul.f32 %v1934_v49, %v1917_v2 }
 0x194   :  { %v1975_v50 = vadd.f32 %v1944_v20, %v886_v8  ;;  %v1978_v51 = vadd.f32 %v1944_v20, %v887_v61  ;;  %v1981_v30 = vadd.f32 %v1944_v20, %v888_v44  ;;  %v1984_v5 = vadd.f32 %v1944_v20, %v889_v58 }
 0x195   :  { %v1987_v16 = vadd.f32 %v1944_v20, %v890_v35  ;;  %v1990_v23 = vadd.f32 %v1944_v20, %v891_v19  ;;  %v1993_v2 = vadd.f32 %v1944_v20, %v892_v52  ;;  %v1996_v56 = vadd.f32 %v1944_v20, %v893_v26  ;;  %v2631_v52 = vld [vmem:[#allocation9_spill] sm:$0xff]  ;;  %v2632_v26 = vld [vmem:[#allocation11_spill] sm:$0xff] }
 0x196   :  { %2613 = vst [vmem:[#allocation26_spill] sm:$0xff] %v1981_v30  ;;  %v1999_v53 = vadd.f32 %v1944_v20, %v894_v25  ;;  %v2002_v41 = vadd.f32 %v1944_v20, %v895_v29  ;;  %v2005_v15 = vadd.f32 %v1944_v20, %v896_v55  ;;  %v2008_v54 = vadd.f32 %v1944_v20, %v897_v33  ;;  %v2633_v25 = vld [vmem:[#allocation13_spill] sm:$0xff]  ;;  %v2634_v29 = vld [vmem:[#allocation15_spill] sm:$0xff] }
 0x197   :  { %2614 = vst [vmem:[#allocation27_spill] sm:$0xff] %v1984_v5  ;;  %v2011_v42 = vadd.f32 %v1944_v20, %v898_v38  ;;  %v2014_v12 = vadd.f32 %v1944_v20, %v899_v57  ;;  %v2017_v40 = vadd.f32 %v1944_v20, %v900_v47  ;;  %v2020_v48 = vadd.f32 %v1944_v20, %v901_v39  ;;  %v2635_v33 = vld [vmem:[#allocation17_spill] sm:$0xff]  ;;  %v2636_v57 = vld [vmem:[#allocation19_spill] sm:$0xff] }
 0x198   :  { %2615 = vst [vmem:[#allocation28_spill] sm:$0xff] %v1987_v16  ;;  %v2023_v32 = vadd.f32 %v1944_v20, %v902_v37  ;;  %v2026_v11 = vadd.f32 %v1944_v20, %v903_v43  ;;  %v840_v27 = vmul.f32 %v1934_v49, %v1568_v59  ;;  %v841_v8 = vmul.f32 %v1934_v49, %v1580_v63  ;;  %v2637_v39 = vld [vmem:[#allocation21_spill] sm:$0xff]  ;;  %v2638_v43 = vld [vmem:[#allocation23_spill] sm:$0xff] }
 0x199   :  { %2616 = vst [vmem:[#allocation29_spill] sm:$0xff] %v1990_v23  ;;  %v842_v61 = vmul.f32 %v1934_v49, %v1592_v3  ;;  %v843_v44 = vmul.f32 %v1934_v49, %v1604_v7  ;;  %v844_v58 = vmul.f32 %v1934_v49, %v1612_v10  ;;  %v845_v59 = vmul.f32 %v1934_v49, %v1622_v14 }
 0x19a   :  { %2617 = vst [vmem:[#allocation30_spill] sm:$0xff] %v1993_v2  ;;  %v907_v36 = vadd.f32 %v1944_v20, %v840_v27  ;;  %v846_v35 = vmul.f32 %v1934_v49, %v1630_v17  ;;  %v847_v63 = vmul.f32 %v1934_v49, %v1640_v21  ;;  %v848_v3 = vmul.f32 %v1934_v49, %v1646_v24 }
 0x19b   :  { %2618 = vst [vmem:[#allocation31_spill] sm:$0xff] %v1996_v56  ;;  %v849_v7 = vmul.f32 %v1934_v49, %v1654_v28  ;;  %v850_v10 = vmul.f32 %v1934_v49, %v1660_v31  ;;  %v851_v19 = vmul.f32 %v1934_v49, %v1666_v34  ;;  %v852_v14 = vmul.f32 %v1934_v49, %v1685_v45 }
 0x19c   :  { %2619 = vst [vmem:[#allocation32_spill] sm:$0xff] %v1999_v53  ;;  %vm971_vm4 = vcmp.gt.f32.partialorder %v907_v36, 0.0  ;;  %v1035_v22 = vmul.f32 0.1, %v907_v36  ;;  %v2060_v17 = vmul.f32 %v1934_v49, %v1705_v1  ;;  %v2064_v21 = vmul.f32 %v1934_v49, %v1723_v46  ;;  %v2629_v46 = vld [vmem:[#allocation5_spill] sm:$0xff] }
 0x19d   :  { %2620 = vst [vmem:[#allocation33_spill] sm:$0xff] %v2002_v41  ;;  %v2068_v24 = vmul.f32 %v1934_v49, %v1739_v6  ;;  %v2072_v28 = vmul.f32 %v1934_v49, %v1570_v60  ;;  %v2076_v31 = vmul.f32 %v1934_v49, %v1582_v0  ;;  %v2080_v34 = vmul.f32 %v1934_v49, %v1594_v4  ;;  %v2630_v6 = vld [vmem:[#allocation7_spill] sm:$0xff]  ;;  %v2652_v41 = vld [vmem:[#allocation25_spill] sm:$0xff] }
 0x19e   :  { %2621 = vst [vmem:[#allocation34_spill] sm:$0xff] %v2005_v15  ;;  %v1099_v62 = vsel %vm971_vm4, %v907_v36, %v1035_v22  ;;  %v2084_v45 = vmul.f32 %v1934_v49, %v1609_v9  ;;  %v2088_v1 = vmul.f32 %v1934_v49, %v1620_v13  ;;  %v2092_v60 = vmul.f32 %v1934_v49, %v1632_v18  ;;  %v2639_v22 = vld [vmem:[#allocation2_spill] sm:$0xff] }
 0x19f   :  { %2622 = vst [vmem:[#allocation35_spill] sm:$0xff] %v2008_v54  ;;  %v2096_v0 = vmul.f32 %v1934_v49, %v2629_v46  ;;  %v2100_v4 = vmul.f32 %v1934_v49, %v2630_v6  ;;  %v2104_v9 = vmul.f32 %v1934_v49, %v2631_v52  ;;  %v2108_v13 = vmul.f32 %v1934_v49, %v2632_v26  ;;  %v2640_v46 = vld [vmem:[#allocation3_spill] sm:$0xff]  ;;  %v2641_v52 = vld [vmem:[#allocation4_spill] sm:$0xff] }
 0x1a0   :  { %2623 = vst [vmem:[#allocation36_spill] sm:$0xff] %v2011_v42  ;;  %v2112_v18 = vmul.f32 %v1934_v49, %v2633_v25  ;;  %v2116_v55 = vmul.f32 %v1934_v49, %v2634_v29  ;;  %v2120_v38 = vmul.f32 %v1934_v49, %v2635_v33  ;;  %v2124_v47 = vmul.f32 %v1934_v49, %v2636_v57  ;;  %v2642_v29 = vld [vmem:[#allocation6_spill] sm:$0xff]  ;;  %v2643_v57 = vld [vmem:[#allocation8_spill] sm:$0xff] }
 0x1a1   :  { %2624 = vst [vmem:[#allocation37_spill] sm:$0xff] %v2014_v12  ;;  %v2128_v37 = vmul.f32 %v1934_v49, %v2637_v39  ;;  %v2132_v27 = vmul.f32 %v1934_v49, %v2638_v43  ;;  %v908_v36 = vadd.f32 %v1944_v20, %v841_v8  ;;  %v2141_v6 = vmul.f32 %v1934_v49, %v2640_v46  ;;  %v2644_v39 = vld [vmem:[#allocation10_spill] sm:$0xff]  ;;  %v2645_v46 = vld [vmem:[#allocation12_spill] sm:$0xff] }
 0x1a2   :  { %2625 = vst [vmem:[#allocation38_spill] sm:$0xff] %v2017_v40  ;;  %v2145_v26 = vmul.f32 %v1934_v49, %v2641_v52  ;;  %v909_v25 = vadd.f32 %v1944_v20, %v842_v61  ;;  %v2150_v33 = vmul.f32 %v1934_v49, %v2642_v29  ;;  %v2154_v8 = vmul.f32 %v1934_v49, %v2643_v57  ;;  %v2647_v29 = vld [vmem:[#allocation16_spill] sm:$0xff]  ;;  %v2650_v42 = vld [vmem:[#allocation22_spill] sm:$0xff] }
 0x1a3   :  { %2626 = vst [vmem:[#allocation39_spill] sm:$0xff] %v2020_v48  ;;  %v2158_v43 = vmul.f32 %v1934_v49, %v2644_v39  ;;  %v2163_v52 = vmul.f32 %v1934_v49, %v2645_v46  ;;  %v911_v57 = vadd.f32 %v1944_v20, %v844_v58  ;;  %v2648_v48 = vld [vmem:[#allocation18_spill] sm:$0xff]  ;;  %v2649_v40 = vld [vmem:[#allocation20_spill] sm:$0xff]  ;;  %v912_v46 = vadd.f32 %v1944_v20, %v845_v59 }
 0x1a4   :  { %2627 = vst [vmem:[#allocation40_spill] sm:$0xff] %v2023_v32  ;;  %v2171_v32 = vmul.f32 %v1934_v49, %v2647_v29  ;;  %v2176_v39 = vmul.f32 %v1934_v49, %v2648_v48  ;;  %v1036_v12 = vmul.f32 0.1, %v908_v36  ;;  %v913_v29 = vadd.f32 %v1944_v20, %v846_v35  ;;  %v2651_v58 = vld [vmem:[#allocation24_spill] sm:$0xff] }
 0x1a5   :  { %2628 = vst [vmem:[#allocation41_spill] sm:$0xff] %v2026_v11  ;;  %v2646_v11 = vld [vmem:[#allocation14_spill] sm:$0xff]  ;;  %vm972_vm5 = vcmp.gt.f32.partialorder %v908_v36, 0.0  ;;  %v1037_v54 = vmul.f32 0.1, %v909_v25  ;;  %v2190_v15 = vmul.f32 %v1934_v49, %v2651_v58  ;;  %v914_v48 = vadd.f32 %v1944_v20, %v847_v63 }
 0x1a6   :  { %1163 = vst [vmem:[%s2548_s4] sm:$0xff] %v1099_v62  ;;  %v2137_v62 = vmul.f32 %v1934_v49, %v2639_v22  ;;  %v910_v22 = vadd.f32 %v1944_v20, %v843_v44  ;;  %v2167_v61 = vmul.f32 %v1934_v49, %v2646_v11  ;;  %v2180_v44 = vmul.f32 %v1934_v49, %v2649_v40 }
 0x1a7   :  { %v2185_v11 = vmul.f32 %v1934_v49, %v2650_v42  ;;  %vm973_vm6 = vcmp.gt.f32.partialorder %v909_v25, 0.0  ;;  %v2195_v59 = vmul.f32 %v1934_v49, %v2652_v41  ;;  %v915_v53 = vadd.f32 %v1944_v20, %v848_v3 }
 0x1a8   :  { %v1038_v40 = vmul.f32 0.1, %v910_v22  ;;  %vm974_vm7 = vcmp.gt.f32.partialorder %v910_v22, 0.0  ;;  %v1039_v42 = vmul.f32 0.1, %v911_v57  ;;  %v916_v35 = vadd.f32 %v1944_v20, %v849_v7 }
 0x1a9   :  { %vm975_vm8 = vcmp.gt.f32.partialorder %v911_v57, 0.0  ;;  %v1040_v56 = vmul.f32 0.1, %v912_v46  ;;  %v1100_v2 = vsel %vm972_vm5, %v908_v36, %v1036_v12  ;;  %v917_v58 = vadd.f32 %v1944_v20, %v850_v10 }
 0x1aa   :  { %vm976_vm9 = vcmp.gt.f32.partialorder %v912_v46, 0.0  ;;  %v1041_v23 = vmul.f32 0.1, %v913_v29  ;;  %v1101_v63 = vsel %vm973_vm6, %v909_v25, %v1037_v54  ;;  %v918_v16 = vadd.f32 %v1944_v20, %v851_v19  ;;  %1164 = vst [vmem:[%s2548_s4 + $0x8] sm:$0xff] %v1100_v2 }
 0x1ab   :  { %vm977_vm10 = vcmp.gt.f32.partialorder %v913_v29, 0.0  ;;  %v1042_v5 = vmul.f32 0.1, %v914_v48  ;;  %v1102_v49 = vsel %vm974_vm7, %v910_v22, %v1038_v40  ;;  %v919_v41 = vadd.f32 %v1944_v20, %v852_v14  ;;  %1165 = vst [vmem:[%s2548_s4 + $0x10] sm:$0xff] %v1101_v63 }
 0x1ac   :  { %vm978_vm11 = vcmp.gt.f32.partialorder %v914_v48, 0.0  ;;  %v1043_v3 = vmul.f32 0.1, %v915_v53  ;;  %v1103_v30 = vsel %vm975_vm8, %v911_v57, %v1039_v42  ;;  %v920_v12 = vadd.f32 %v1944_v20, %v2060_v17  ;;  %1166 = vst [vmem:[%s2548_s4 + $0x18] sm:$0xff] %v1102_v49 }
 0x1ad   :  { %vm979_vm12 = vcmp.gt.f32.partialorder %v915_v53, 0.0  ;;  %v1044_v7 = vmul.f32 0.1, %v916_v35  ;;  %v1104_v54 = vsel %vm976_vm9, %v912_v46, %v1040_v56  ;;  %v921_v10 = vadd.f32 %v1944_v20, %v2064_v21  ;;  %1167 = vst [vmem:[%s2548_s4 + $0x20] sm:$0xff] %v1103_v30 }
 0x1ae   :  { %vm980_vm13 = vcmp.gt.f32.partialorder %v916_v35, 0.0  ;;  %v1045_v19 = vmul.f32 0.1, %v917_v58  ;;  %v1105_v14 = vsel %vm977_vm10, %v913_v29, %v1041_v23  ;;  %v922_v2 = vadd.f32 %v1944_v20, %v2068_v24  ;;  %1168 = vst [vmem:[%s2548_s4 + $0x28] sm:$0xff] %v1104_v54 }
 0x1af   :  { %vm981_vm14 = vcmp.gt.f32.partialorder %v917_v58, 0.0  ;;  %v1046_v56 = vmul.f32 0.1, %v918_v16  ;;  %v1106_v17 = vsel %vm978_vm11, %v914_v48, %v1042_v5  ;;  %v923_v21 = vadd.f32 %v1944_v20, %v2072_v28  ;;  %1169 = vst [vmem:[%s2548_s4 + $0x30] sm:$0xff] %v1105_v14 }
 0x1b0   :  { %vm982_vm15 = vcmp.gt.f32.partialorder %v918_v16, 0.0  ;;  %v1047_v23 = vmul.f32 0.1, %v919_v41  ;;  %v1107_v36 = vsel %vm979_vm12, %v915_v53, %v1043_v3  ;;  %v924_v24 = vadd.f32 %v1944_v20, %v2076_v31  ;;  %1170 = vst [vmem:[%s2548_s4 + $0x38] sm:$0xff] %v1106_v17 }
 0x1b1   :  { %vm983_vm0 = vcmp.gt.f32.partialorder %v919_v41, 0.0  ;;  %v1048_v5 = vmul.f32 0.1, %v920_v12  ;;  %v1108_v25 = vsel %vm980_vm13, %v916_v35, %v1044_v7  ;;  %v925_v30 = vadd.f32 %v1944_v20, %v2080_v34  ;;  %1171 = vst [vmem:[%s2548_s4 + $0x40] sm:$0xff] %v1107_v36 }
 0x1b2   :  { %vm984_vm1 = vcmp.gt.f32.partialorder %v920_v12, 0.0  ;;  %v1049_v53 = vmul.f32 0.1, %v921_v10  ;;  %v1109_v28 = vsel %vm981_vm14, %v917_v58, %v1045_v19  ;;  %v926_v31 = vadd.f32 %v1944_v20, %v2084_v45  ;;  %1172 = vst [vmem:[%s2548_s4 + $0x48] sm:$0xff] %v1108_v25 }
 0x1b3   :  { %vm985_vm2 = vcmp.gt.f32.partialorder %v921_v10, 0.0  ;;  %v1050_v22 = vmul.f32 0.1, %v922_v2  ;;  %v1110_v57 = vsel %vm982_vm15, %v918_v16, %v1046_v56  ;;  %v927_v34 = vadd.f32 %v1944_v20, %v2088_v1  ;;  %1173 = vst [vmem:[%s2548_s4 + $0x50] sm:$0xff] %v1109_v28 }
 0x1b4   :  { %vm986_vm3 = vcmp.gt.f32.partialorder %v922_v2, 0.0  ;;  %v1051_v46 = vmul.f32 0.1, %v923_v21  ;;  %v1111_v29 = vsel %vm983_vm0, %v919_v41, %v1047_v23  ;;  %v928_v45 = vadd.f32 %v1944_v20, %v2092_v60  ;;  %1174 = vst [vmem:[%s2548_s4 + $0x58] sm:$0xff] %v1110_v57 }
 0x1b5   :  { %vm987_vm4 = vcmp.gt.f32.partialorder %v923_v21, 0.0  ;;  %v1052_v16 = vmul.f32 0.1, %v924_v24  ;;  %v1112_v48 = vsel %vm984_vm1, %v920_v12, %v1048_v5  ;;  %v929_v1 = vadd.f32 %v1944_v20, %v2096_v0  ;;  %1175 = vst [vmem:[%s2548_s4 + $0x60] sm:$0xff] %v1111_v29 }
 0x1b6   :  { %vm988_vm5 = vcmp.gt.f32.partialorder %v924_v24, 0.0  ;;  %v1053_v40 = vmul.f32 0.1, %v925_v30  ;;  %v1113_v42 = vsel %vm985_vm2, %v921_v10, %v1049_v53  ;;  %v930_v60 = vadd.f32 %v1944_v20, %v2100_v4  ;;  %1176 = vst [vmem:[%s2548_s4 + $0x68] sm:$0xff] %v1112_v48 }
 0x1b7   :  { %vm989_vm6 = vcmp.gt.f32.partialorder %v925_v30, 0.0  ;;  %v1054_v35 = vmul.f32 0.1, %v926_v31  ;;  %v1114_v58 = vsel %vm986_vm3, %v922_v2, %v1050_v22  ;;  %v931_v0 = vadd.f32 %v1944_v20, %v2104_v9  ;;  %1177 = vst [vmem:[%s2548_s4 + $0x70] sm:$0xff] %v1113_v42 }
 0x1b8   :  { %vm990_vm7 = vcmp.gt.f32.partialorder %v926_v31, 0.0  ;;  %v1055_v63 = vmul.f32 0.1, %v927_v34  ;;  %v1115_v49 = vsel %vm987_vm4, %v923_v21, %v1051_v46  ;;  %v932_v4 = vadd.f32 %v1944_v20, %v2108_v13  ;;  %1178 = vst [vmem:[%s2548_s4 + $0x78] sm:$0xff] %v1114_v58 }
 0x1b9   :  { %vm991_vm8 = vcmp.gt.f32.partialorder %v927_v34, 0.0  ;;  %v1056_v41 = vmul.f32 0.1, %v928_v45  ;;  %v1116_v3 = vsel %vm988_vm5, %v924_v24, %v1052_v16  ;;  %v933_v9 = vadd.f32 %v1944_v20, %v2112_v18  ;;  %1179 = vst [vmem:[%s2548_s4 + $0x80] sm:$0xff] %v1115_v49 }
 0x1ba   :  { %vm992_vm9 = vcmp.gt.f32.partialorder %v928_v45, 0.0  ;;  %v1057_v12 = vmul.f32 0.1, %v929_v1  ;;  %v1117_v7 = vsel %vm989_vm6, %v925_v30, %v1053_v40  ;;  %v934_v13 = vadd.f32 %v1944_v20, %v2116_v55  ;;  %1180 = vst [vmem:[%s2548_s4 + $0x88] sm:$0xff] %v1116_v3 }
 0x1bb   :  { %vm993_vm10 = vcmp.gt.f32.partialorder %v929_v1, 0.0  ;;  %v1058_v54 = vmul.f32 0.1, %v930_v60  ;;  %v1118_v10 = vsel %vm990_vm7, %v926_v31, %v1054_v35  ;;  %v935_v18 = vadd.f32 %v1944_v20, %v2120_v38  ;;  %1181 = vst [vmem:[%s2548_s4 + $0x90] sm:$0xff] %v1117_v7 }
 0x1bc   :  { %vm994_vm11 = vcmp.gt.f32.partialorder %v930_v60, 0.0  ;;  %v1059_v19 = vmul.f32 0.1, %v931_v0  ;;  %v1119_v14 = vsel %vm991_vm8, %v927_v34, %v1055_v63  ;;  %v936_v55 = vadd.f32 %v1944_v20, %v2124_v47  ;;  %1182 = vst [vmem:[%s2548_s4 + $0x98] sm:$0xff] %v1118_v10 }
 0x1bd   :  { %vm995_vm12 = vcmp.gt.f32.partialorder %v931_v0, 0.0  ;;  %v1060_v2 = vmul.f32 0.1, %v932_v4  ;;  %v1120_v56 = vsel %vm992_vm9, %v928_v45, %v1056_v41  ;;  %v937_v38 = vadd.f32 %v1944_v20, %v2128_v37  ;;  %1183 = vst [vmem:[%s2548_s4 + $0xa0] sm:$0xff] %v1119_v14 }
 0x1be   :  { %vm996_vm13 = vcmp.gt.f32.partialorder %v932_v4, 0.0  ;;  %v1061_v17 = vmul.f32 0.1, %v933_v9  ;;  %v1121_v21 = vsel %vm993_vm10, %v929_v1, %v1057_v12  ;;  %v938_v47 = vadd.f32 %v1944_v20, %v2132_v27  ;;  %1184 = vst [vmem:[%s2548_s4 + $0xa8] sm:$0xff] %v1120_v56 }
 0x1bf   :  { %vm997_vm14 = vcmp.gt.f32.partialorder %v933_v9, 0.0  ;;  %v1062_v23 = vmul.f32 0.1, %v934_v13  ;;  %v1122_v36 = vsel %vm994_vm11, %v930_v60, %v1058_v54  ;;  %v939_v37 = vadd.f32 %v1944_v20, %v2137_v62  ;;  %1185 = vst [vmem:[%s2548_s4 + $0xb0] sm:$0xff] %v1121_v21 }
 0x1c0   :  { %vm998_vm15 = vcmp.gt.f32.partialorder %v934_v13, 0.0  ;;  %v1063_v24 = vmul.f32 0.1, %v935_v18  ;;  %v1123_v5 = vsel %vm995_vm12, %v931_v0, %v1059_v19  ;;  %v940_v27 = vadd.f32 %v1944_v20, %v2141_v6  ;;  %1186 = vst [vmem:[%s2548_s4 + $0xb8] sm:$0xff] %v1122_v36 }
 0x1c1   :  { %vm999_vm0 = vcmp.gt.f32.partialorder %v935_v18, 0.0  ;;  %v1064_v25 = vmul.f32 0.1, %v936_v55  ;;  %v1124_v30 = vsel %vm996_vm13, %v932_v4, %v1060_v2  ;;  %v941_v62 = vadd.f32 %v1944_v20, %v2145_v26  ;;  %1187 = vst [vmem:[%s2548_s4 + $0xc0] sm:$0xff] %v1123_v5  ;;  %v2653_v2 = vld [vmem:[#allocation26_spill] sm:$0xff] }
 0x1c2   :  { %vm1000_vm1 = vcmp.gt.f32.partialorder %v936_v55, 0.0  ;;  %v1065_v53 = vmul.f32 0.1, %v937_v38  ;;  %v1125_v28 = vsel %vm997_vm14, %v933_v9, %v1061_v17  ;;  %v942_v6 = vadd.f32 %v1944_v20, %v2150_v33  ;;  %1188 = vst [vmem:[%s2548_s4 + $0xc8] sm:$0xff] %v1124_v30  ;;  %v2654_v17 = vld [vmem:[#allocation27_spill] sm:$0xff] }
 0x1c3   :  { %vm1001_vm2 = vcmp.gt.f32.partialorder %v937_v38, 0.0  ;;  %v1066_v31 = vmul.f32 0.1, %v938_v47  ;;  %v1126_v22 = vsel %vm998_vm15, %v934_v13, %v1062_v23  ;;  %v943_v26 = vadd.f32 %v1944_v20, %v2154_v8  ;;  %1189 = vst [vmem:[%s2548_s4 + $0xd0] sm:$0xff] %v1125_v28  ;;  %v2655_v23 = vld [vmem:[#allocation28_spill] sm:$0xff] }
 0x1c4   :  { %vm1002_vm3 = vcmp.gt.f32.partialorder %v938_v47, 0.0  ;;  %v1067_v57 = vmul.f32 0.1, %v939_v37  ;;  %v1127_v34 = vsel %vm999_vm0, %v935_v18, %v1063_v24  ;;  %v944_v33 = vadd.f32 %v1944_v20, %v2158_v43  ;;  %1190 = vst [vmem:[%s2548_s4 + $0xd8] sm:$0xff] %v1126_v22  ;;  %v2656_v24 = vld [vmem:[#allocation29_spill] sm:$0xff]  ;;  %v2659_v28 = vld [vmem:[#allocation32_spill] sm:$0xff] }
 0x1c5   :  { %vm1003_vm4 = vcmp.gt.f32.partialorder %v939_v37, 0.0  ;;  %v1068_v46 = vmul.f32 0.1, %v940_v27  ;;  %v1128_v29 = vsel %vm1000_vm1, %v936_v55, %v1064_v25  ;;  %v945_v8 = vadd.f32 %v1944_v20, %v2163_v52  ;;  %1191 = vst [vmem:[%s2548_s4 + $0xe0] sm:$0xff] %v1127_v34  ;;  %v2657_v25 = vld [vmem:[#allocation30_spill] sm:$0xff]  ;;  %v2660_v22 = vld [vmem:[#allocation33_spill] sm:$0xff] }
 0x1c6   :  { %vm1004_vm5 = vcmp.gt.f32.partialorder %v940_v27, 0.0  ;;  %v1069_v45 = vmul.f32 0.1, %v941_v62  ;;  %v1129_v16 = vsel %vm1001_vm2, %v937_v38, %v1065_v53  ;;  %v946_v43 = vadd.f32 %v1944_v20, %v2167_v61  ;;  %1192 = vst [vmem:[%s2548_s4 + $0xe8] sm:$0xff] %v1128_v29  ;;  %v2661_v34 = vld [vmem:[#allocation34_spill] sm:$0xff]  ;;  %v2662_v29 = vld [vmem:[#allocation35_spill] sm:$0xff] }
 0x1c7   :  { %vm1005_vm6 = vcmp.gt.f32.partialorder %v941_v62, 0.0  ;;  %v1070_v48 = vmul.f32 0.1, %v942_v6  ;;  %v1130_v1 = vsel %vm1002_vm3, %v938_v47, %v1066_v31  ;;  %v947_v52 = vadd.f32 %v1944_v20, %v2171_v32  ;;  %1193 = vst [vmem:[%s2548_s4 + $0xf0] sm:$0xff] %v1129_v16  ;;  %v2663_v16 = vld [vmem:[#allocation36_spill] sm:$0xff] }
 0x1c8   :  { %vm1006_vm7 = vcmp.gt.f32.partialorder %v942_v6, 0.0  ;;  %v1071_v40 = vmul.f32 0.1, %v943_v26  ;;  %v1131_v42 = vsel %vm1003_vm4, %v939_v37, %v1067_v57  ;;  %v948_v61 = vadd.f32 %v1944_v20, %v2176_v39  ;;  %1194 = vst [vmem:[%s2548_s4 + $0xf8] sm:$0xff] %v1130_v1  ;;  %v2664_v1 = vld [vmem:[#allocation37_spill] sm:$0xff] }
 0x1c9   :  { %vm1007_vm8 = vcmp.gt.f32.partialorder %v943_v26, 0.0  ;;  %v1072_v60 = vmul.f32 0.1, %v944_v33  ;;  %v1132_v35 = vsel %vm1004_vm5, %v940_v27, %v1068_v46  ;;  %v949_v32 = vadd.f32 %v1944_v20, %v2180_v44  ;;  %1195 = vst [vmem:[%s2548_s4 + $0x100] sm:$0xff] %v1131_v42  ;;  %v2665_v42 = vld [vmem:[#allocation38_spill] sm:$0xff] }
 0x1ca   :  { %vm1008_vm9 = vcmp.gt.f32.partialorder %v944_v33, 0.0  ;;  %v1073_v58 = vmul.f32 0.1, %v945_v8  ;;  %v1133_v0 = vsel %vm1005_vm6, %v941_v62, %v1069_v45  ;;  %v950_v39 = vadd.f32 %v1944_v20, %v2185_v11  ;;  %1196 = vst [vmem:[%s2548_s4 + $0x108] sm:$0xff] %v1132_v35  ;;  %v2658_v62 = vld [vmem:[#allocation31_spill] sm:$0xff] }
 0x1cb   :  { %vm1009_vm10 = vcmp.gt.f32.partialorder %v945_v8, 0.0  ;;  %v1074_v63 = vmul.f32 0.1, %v946_v43  ;;  %v1134_v49 = vsel %vm1006_vm7, %v942_v6, %v1070_v48  ;;  %v951_v44 = vadd.f32 %v1944_v20, %v2190_v15  ;;  %1197 = vst [vmem:[%s2548_s4 + $0x110] sm:$0xff] %v1133_v0  ;;  %v2666_v35 = vld [vmem:[#allocation39_spill] sm:$0xff]  ;;  %v2667_v0 = vld [vmem:[#allocation40_spill] sm:$0xff] }
 0x1cc   :  { %vm1010_vm11 = vcmp.gt.f32.partialorder %v946_v43, 0.0  ;;  %v1075_v4 = vmul.f32 0.1, %v947_v52  ;;  %v1135_v41 = vsel %vm1007_vm8, %v943_v26, %v1071_v40  ;;  %v952_v11 = vadd.f32 %v1944_v20, %v2195_v59  ;;  %1198 = vst [vmem:[%s2548_s4 + $0x118] sm:$0xff] %v1134_v49  ;;  %v2668_v49 = vld [vmem:[#allocation41_spill] sm:$0xff] }
 0x1cd   :  { %vm1011_vm12 = vcmp.gt.f32.partialorder %v947_v52, 0.0  ;;  %v1076_v3 = vmul.f32 0.1, %v948_v61  ;;  %v1136_v9 = vsel %vm1008_vm9, %v944_v33, %v1072_v60  ;;  %vm1012_vm13 = vcmp.gt.f32.partialorder %v948_v61, 0.0  ;;  %1199 = vst [vmem:[%s2548_s4 + $0x120] sm:$0xff] %v1135_v41 }
 0x1ce   :  { %v1077_v15 = vmul.f32 0.1, %v949_v32  ;;  %v1137_v12 = vsel %vm1009_vm10, %v945_v8, %v1073_v58  ;;  %vm1013_vm14 = vcmp.gt.f32.partialorder %v949_v32, 0.0  ;;  %v1078_v7 = vmul.f32 0.1, %v950_v39  ;;  %1200 = vst [vmem:[%s2548_s4 + $0x128] sm:$0xff] %v1136_v9 }
 0x1cf   :  { %v1138_v13 = vsel %vm1010_vm11, %v946_v43, %v1074_v63  ;;  %vm1014_vm15 = vcmp.gt.f32.partialorder %v950_v39, 0.0  ;;  %v1079_v20 = vmul.f32 0.1, %v951_v44  ;;  %v1139_v59 = vsel %vm1011_vm12, %v947_v52, %v1075_v4  ;;  %1201 = vst [vmem:[%s2548_s4 + $0x130] sm:$0xff] %v1137_v12 }
 0x1d0   :  { %vm1015_vm0 = vcmp.gt.f32.partialorder %v951_v44, 0.0  ;;  %v1080_v54 = vmul.f32 0.1, %v952_v11  ;;  %v1140_v10 = vsel %vm1012_vm13, %v948_v61, %v1076_v3  ;;  %vm1016_vm1 = vcmp.gt.f32.partialorder %v952_v11, 0.0  ;;  %1202 = vst [vmem:[%s2548_s4 + $0x138] sm:$0xff] %v1138_v13 }
 0x1d1   :  { %v1081_v18 = vmul.f32 0.1, %v1975_v50  ;;  %v1141_v19 = vsel %vm1013_vm14, %v949_v32, %v1077_v15  ;;  %vm1017_vm2 = vcmp.gt.f32.partialorder %v1975_v50, 0.0  ;;  %v1082_v14 = vmul.f32 0.1, %v1978_v51  ;;  %1203 = vst [vmem:[%s2548_s4 + $0x140] sm:$0xff] %v1139_v59 }
 0x1d2   :  { %v1142_v55 = vsel %vm1014_vm15, %v950_v39, %v1078_v7  ;;  %vm1018_vm3 = vcmp.gt.f32.partialorder %v1978_v51, 0.0  ;;  %v1083_v56 = vmul.f32 0.1, %v2653_v2  ;;  %v1143_v38 = vsel %vm1015_vm0, %v951_v44, %v1079_v20  ;;  %1204 = vst [vmem:[%s2548_s4 + $0x148] sm:$0xff] %v1140_v10 }
 0x1d3   :  { %vm1019_vm4 = vcmp.gt.f32.partialorder %v2653_v2, 0.0  ;;  %v1084_v21 = vmul.f32 0.1, %v2654_v17  ;;  %v1144_v47 = vsel %vm1016_vm1, %v952_v11, %v1080_v54  ;;  %1205 = vst [vmem:[%s2548_s4 + $0x150] sm:$0xff] %v1141_v19  ;;  %vm1020_vm5 = vcmp.gt.f32.partialorder %v2654_v17, 0.0 }
 0x1d4   :  { %v1085_v36 = vmul.f32 0.1, %v2655_v23  ;;  %v1145_v37 = vsel %vm1017_vm2, %v1975_v50, %v1081_v18  ;;  %1206 = vst [vmem:[%s2548_s4 + $0x158] sm:$0xff] %v1142_v55  ;;  %vm1021_vm6 = vcmp.gt.f32.partialorder %v2655_v23, 0.0  ;;  %v1086_v5 = vmul.f32 0.1, %v2656_v24 }
 0x1d5   :  { %v1146_v27 = vsel %vm1018_vm3, %v1978_v51, %v1082_v14  ;;  %1207 = vst [vmem:[%s2548_s4 + $0x160] sm:$0xff] %v1143_v38  ;;  %vm1022_vm7 = vcmp.gt.f32.partialorder %v2656_v24, 0.0  ;;  %v1087_v30 = vmul.f32 0.1, %v2657_v25  ;;  %v1147_v50 = vsel %vm1019_vm4, %v2653_v2, %v1083_v56 }
 0x1d6   :  { %1208 = vst [vmem:[%s2548_s4 + $0x168] sm:$0xff] %v1144_v47  ;;  %vm1023_vm8 = vcmp.gt.f32.partialorder %v2657_v25, 0.0  ;;  %v1088_v53 = vmul.f32 0.1, %v2658_v62  ;;  %v1148_v51 = vsel %vm1020_vm5, %v2654_v17, %v1084_v21  ;;  %vm1024_vm9 = vcmp.gt.f32.partialorder %v2658_v62, 0.0 }
 0x1d7   :  { %1209 = vst [vmem:[%s2548_s4 + $0x170] sm:$0xff] %v1145_v37  ;;  %v1089_v6 = vmul.f32 0.1, %v2659_v28  ;;  %v1149_v31 = vsel %vm1021_vm6, %v2655_v23, %v1085_v36  ;;  %vm1025_vm10 = vcmp.gt.f32.partialorder %v2659_v28, 0.0  ;;  %v1090_v26 = vmul.f32 0.1, %v2660_v22 }
 0x1d8   :  { %1210 = vst [vmem:[%s2548_s4 + $0x178] sm:$0xff] %v1146_v27  ;;  %v1150_v57 = vsel %vm1022_vm7, %v2656_v24, %v1086_v5  ;;  %vm1026_vm11 = vcmp.gt.f32.partialorder %v2660_v22, 0.0  ;;  %v1091_v33 = vmul.f32 0.1, %v2661_v34  ;;  %v1151_v46 = vsel %vm1023_vm8, %v2657_v25, %v1087_v30 }
 0x1d9   :  { %1211 = vst [vmem:[%s2548_s4 + $0x180] sm:$0xff] %v1147_v50  ;;  %vm1027_vm12 = vcmp.gt.f32.partialorder %v2661_v34, 0.0  ;;  %v1092_v8 = vmul.f32 0.1, %v2662_v29  ;;  %v1152_v45 = vsel %vm1024_vm9, %v2658_v62, %v1088_v53  ;;  %vm1028_vm13 = vcmp.gt.f32.partialorder %v2662_v29, 0.0 }
 0x1da   :  { %1212 = vst [vmem:[%s2548_s4 + $0x188] sm:$0xff] %v1148_v51  ;;  %v1093_v43 = vmul.f32 0.1, %v2663_v16  ;;  %v1153_v48 = vsel %vm1025_vm10, %v2659_v28, %v1089_v6  ;;  %vm1029_vm14 = vcmp.gt.f32.partialorder %v2663_v16, 0.0  ;;  %v1094_v52 = vmul.f32 0.1, %v2664_v1 }
 0x1db   :  { %1213 = vst [vmem:[%s2548_s4 + $0x190] sm:$0xff] %v1149_v31  ;;  %v1154_v40 = vsel %vm1026_vm11, %v2660_v22, %v1090_v26  ;;  %vm1030_vm15 = vcmp.gt.f32.partialorder %v2664_v1, 0.0  ;;  %v1095_v61 = vmul.f32 0.1, %v2665_v42  ;;  %v1155_v60 = vsel %vm1027_vm12, %v2661_v34, %v1091_v33 }
 0x1dc   :  { %1214 = vst [vmem:[%s2548_s4 + $0x198] sm:$0xff] %v1150_v57  ;;  %vm1031_vm0 = vcmp.gt.f32.partialorder %v2665_v42, 0.0  ;;  %v1096_v32 = vmul.f32 0.1, %v2666_v35  ;;  %v1156_v58 = vsel %vm1028_vm13, %v2662_v29, %v1092_v8  ;;  %vm1032_vm1 = vcmp.gt.f32.partialorder %v2666_v35, 0.0 }
 0x1dd   :  { %1215 = vst [vmem:[%s2548_s4 + $0x1a0] sm:$0xff] %v1151_v46  ;;  %v1097_v39 = vmul.f32 0.1, %v2667_v0  ;;  %v1157_v63 = vsel %vm1029_vm14, %v2663_v16, %v1093_v43  ;;  %vm1033_vm2 = vcmp.gt.f32.partialorder %v2667_v0, 0.0  ;;  %v1098_v44 = vmul.f32 0.1, %v2668_v49 }
 0x1de   :  { %1216 = vst [vmem:[%s2548_s4 + $0x1a8] sm:$0xff] %v1152_v45  ;;  %v1158_v4 = vsel %vm1030_vm15, %v2664_v1, %v1094_v52  ;;  %vm1034_vm3 = vcmp.gt.f32.partialorder %v2668_v49, 0.0  ;;  %v1159_v41 = vsel %vm1031_vm0, %v2665_v42, %v1095_v61  ;;  %v1160_v11 = vsel %vm1032_vm1, %v2666_v35, %v1096_v32 }
 0x1df   :  { %1217 = vst [vmem:[%s2548_s4 + $0x1b0] sm:$0xff] %v1153_v48  ;;  %v1161_v3 = vsel %vm1033_vm2, %v2667_v0, %v1097_v39  ;;  %v1162_v9 = vsel %vm1034_vm3, %v2668_v49, %v1098_v44 }
 0x1e0   :  { %1218 = vst [vmem:[%s2548_s4 + $0x1b8] sm:$0xff] %v1154_v40 }
 0x1e1   :  { %1219 = vst [vmem:[%s2548_s4 + $0x1c0] sm:$0xff] %v1155_v60 }
 0x1e2   :  { %1220 = vst [vmem:[%s2548_s4 + $0x1c8] sm:$0xff] %v1156_v58 }
 0x1e3   :  { %1221 = vst [vmem:[%s2548_s4 + $0x1d0] sm:$0xff] %v1157_v63 }
 0x1e4   :  { %1222 = vst [vmem:[%s2548_s4 + $0x1d8] sm:$0xff] %v1158_v4 }
 0x1e5   :  { %1223 = vst [vmem:[%s2548_s4 + $0x1e0] sm:$0xff] %v1159_v41 }
 0x1e6   :  { %1224 = vst [vmem:[%s2548_s4 + $0x1e8] sm:$0xff] %v1160_v11 }
 0x1e7   :  { %1225 = vst [vmem:[%s2548_s4 + $0x1f0] sm:$0xff] %v1161_v3 }
 0x1e8   :  { %1226 = vst [vmem:[%s2548_s4 + $0x1f8] sm:$0xff] %v1162_v9 }

</bundles_post_ra>
